<compile_context>
chip_gen: v7x
topology: tpu7x:2x2x1
jax: 0.10.0
libtpu: 0.0.40
codegen_flags: <defaults>
</compile_context>

<pallas_src>
import jax
import jax.numpy as jnp
from jax.experimental import pallas as pl
from jax.experimental.pallas import tpu as pltpu

LAYER_DIMS = [784, 512, 256, 128, 64, 32, 10]       # true nn.Linear dims
PADDED_DIMS = [784, 512, 256, 128, 128, 128, 128]   # lane-padded dims used in-kernel
NUM_LAYERS = len(LAYER_DIMS) - 1
NUM_CLASSES = LAYER_DIMS[-1]
IN_FEATURES = LAYER_DIMS[0]
PAD_OUT = PADDED_DIMS[-1]
DEFAULT_TILE_B = 512     # ~85% of HBM roofline per tiling measurements; ~8 MiB footprint
BATCH_ALIGN = 16         # bf16 sublane tile
NEG_LARGE = -1e30        # finite "-inf": contributes exactly 0 to softmax sum


def _round_up(x, m):
    return ((x + m - 1) // m) * m


def _mlp_kernel(x_ref,
                w1, b1, w2, b2, w3, b3, w4, b4, w5, b5, w6, b6,
                out_ref):
    h = x_ref[...]  # bf16 (tb, 784)

    # fc1..fc5: bf16 MXU matmuls with f32 accumulation; bias + ReLU in f32.
    # Padded hidden columns stay exactly 0 (0*W + 0 bias -> relu -> 0).
    for w, b in ((w1, b1), (w2, b2), (w3, b3), (w4, b4), (w5, b5)):
        acc = jnp.dot(h, w[...], preferred_element_type=jnp.float32)
        h = jnp.maximum(acc + b[...], 0.0).astype(jnp.bfloat16)

    # fc6 (no activation) into a full 128-lane f32 slab.
    logits = jnp.dot(h, w6[...], preferred_element_type=jnp.float32) + b6[...]

    # Mask the 118 padded logit lanes with a large finite negative so log_softmax
    # over the real 10 classes is unchanged and the raw buffer stays finite.
    lane = jax.lax.broadcasted_iota(jnp.int32, logits.shape, dimension=1)
    logits = jnp.where(lane < NUM_CLASSES, logits, NEG_LARGE)

    # log_softmax along dim=1 (numerically stable), lane-dense (tb, 128) store.
    m = jnp.max(logits, axis=-1, keepdims=True)
    shifted = logits - m
    lse = jnp.log(jnp.sum(jnp.exp(shifted), axis=-1, keepdims=True))
    out_ref[...] = shifted - lse


def prepare_params(params):
    """Zero-pad the narrow tail layers to 128 features and cast weights to bf16.

    Call once (hoisted out of the forward).  Biases stay f32: the bias add and
    ReLU happen on the f32 MXU accumulator.
    """
    flat = []
    for i, (w, b) in enumerate(params):
        in_p, out_p = PADDED_DIMS[i], PADDED_DIMS[i + 1]
        w = jnp.pad(w, ((0, in_p - w.shape[0]), (0, out_p - w.shape[1])))
        b = jnp.pad(b, ((0, 0), (0, out_p - b.shape[1])))
        flat.append(w.astype(jnp.bfloat16))
        flat.append(b.astype(jnp.float32))
    return tuple(flat)


def _choose_tiling(batch, tile_b):
    """Pick (tile, padded_batch): tile is a multiple of 16 (bf16 sublanes) and,
    when the batch is big enough, there are >= 2 grid steps (keeps both v7x
    TensorCores busy under dimension_semantics=('parallel',))."""
    b16 = _round_up(max(batch, 1), BATCH_ALIGN)
    tile_b = max(BATCH_ALIGN, _round_up(tile_b, BATCH_ALIGN))
    steps = -(-b16 // tile_b)                 # cdiv
    if b16 >= 2 * BATCH_ALIGN:
        steps = max(steps, 2)
    tb = _round_up(-(-b16 // steps), BATCH_ALIGN)
    return tb, steps * tb


def mlp_forward(x, flat_params, tile_b=DEFAULT_TILE_B):
    """x: anything reshapeable to (..., 784).  flat_params: prepare_params() output.

    Jit this with tile_b static (see __main__); shapes are static under jit so
    all the tiling arithmetic below resolves at trace time.
    """
    x = x.reshape(-1, IN_FEATURES).astype(jnp.bfloat16)
    batch = x.shape[0]

    tb, padded_batch = _choose_tiling(batch, tile_b)
    if padded_batch != batch:
        x = jnp.pad(x, ((0, padded_batch - batch), (0, 0)))

    grid = (padded_batch // tb,)
    x_spec = pl.BlockSpec((tb, IN_FEATURES), lambda i: (i, 0))
    # Weights/biases: full-array blocks with constant index_maps -> fetched once,
    # VMEM-resident across the whole batch grid (~1.2 MiB of bf16 weights).
    param_specs = [pl.BlockSpec(p.shape, lambda i: (0, 0)) for p in flat_params]
    out_spec = pl.BlockSpec((tb, PAD_OUT), lambda i: (i, 0))

    # Advisory cost estimate so XLA schedules around the custom call sensibly.
    matmul_flops = 2 * padded_batch * sum(
        PADDED_DIMS[i] * PADDED_DIMS[i + 1] for i in range(NUM_LAYERS))
    param_bytes = sum(p.size * p.dtype.itemsize for p in flat_params)
    bytes_accessed = (padded_batch * IN_FEATURES * 2        # bf16 activations in
                      + param_bytes                          # weights + biases
                      + padded_batch * PAD_OUT * 4)          # f32 log-probs out
    cost = pl.CostEstimate(flops=matmul_flops,
                           transcendentals=padded_batch * (PAD_OUT + 1),
                           bytes_accessed=bytes_accessed)

    out = pl.pallas_call(
        _mlp_kernel,
        out_shape=jax.ShapeDtypeStruct((padded_batch, PAD_OUT), jnp.float32),
        grid=grid,
        in_specs=[x_spec] + param_specs,
        out_specs=out_spec,
        compiler_params=pltpu.CompilerParams(
            dimension_semantics=("parallel",),   # shard batch tiles across v7x's 2 TCs
            vmem_limit_bytes=32 << 20,           # above v5e's 16 MiB default, fits v7x
        ),
        cost_estimate=cost,
    )(x, *flat_params)

    return out[:batch, :NUM_CLASSES]


def init_params(key):
    """Deterministic init matching nn.Linear shapes (stored transposed as (in, out))."""
    params = []
    for i in range(NUM_LAYERS):
        fan_in, fan_out = LAYER_DIMS[i], LAYER_DIMS[i + 1]
        key, kw, kb = jax.random.split(key, 3)
        bound = 1.0 / jnp.sqrt(jnp.float32(fan_in))
        w = jax.random.uniform(kw, (fan_in, fan_out), jnp.float32, -bound, bound)
        b = jax.random.uniform(kb, (1, fan_out), jnp.float32, -bound, bound)
        params.append((w, b))
    return params


def reference_forward(x, params):
    """Pure-JAX reference using the same precision recipe as the kernel
    (bf16 matmul operands, f32 accumulation / bias / ReLU / log_softmax)."""
    h = x.reshape(-1, IN_FEATURES).astype(jnp.bfloat16)
    for i, (w, b) in enumerate(params):
        acc = jnp.dot(h, w.astype(jnp.bfloat16),
                      preferred_element_type=jnp.float32) + b
        if i < len(params) - 1:
            h = jnp.maximum(acc, 0.0).astype(jnp.bfloat16)
        else:
            h = acc
    return jax.nn.log_softmax(h, axis=1)


if __name__ == "__main__":
    key = jax.random.PRNGKey(0)
    key, kx = jax.random.split(key)

    params = init_params(key)
    flat_params = prepare_params(params)          # pad + bf16-cast once (hoisted)
    fwd = jax.jit(mlp_forward, static_argnames=("tile_b",))

    # Small MNIST-like input: (B, 1, 28, 28) flattened to (B, 784) by the forward.
    B = 8
    x = jax.random.normal(kx, (B, 1, 28, 28), jnp.float32)
    out = jax.block_until_ready(fwd(x, flat_params))
    ref = reference_forward(x, params)
    assert out.shape == (B, NUM_CLASSES)
    assert jnp.allclose(out, ref, atol=2e-3, rtol=2e-3), "mismatch vs reference (B=8)"

    # Exercise the multi-step grid + batch-padding path (B not tile-aligned).
    key, kx2 = jax.random.split(key)
    B2 = 260
    x2 = jax.random.normal(kx2, (B2, 784), jnp.float32)
    out2 = jax.block_until_ready(fwd(x2, flat_params, tile_b=128))
    ref2 = reference_forward(x2, params)
    assert out2.shape == (B2, NUM_CLASSES)
    assert jnp.allclose(out2, ref2, atol=2e-3, rtol=2e-3), "mismatch vs reference (B=260)"

    print("KERNEL_OK")
</pallas_src>

<mosaic_0001>
module attributes {stable_mosaic.version = 11 : i64} {
  func.func @_mlp_kernel(%arg0: i32, %arg1: memref<16x784xbf16, #tpu.memory_space<vmem>>, %arg2: memref<784x512xbf16, #tpu.memory_space<vmem>>, %arg3: memref<1x512xf32, #tpu.memory_space<vmem>>, %arg4: memref<512x256xbf16, #tpu.memory_space<vmem>>, %arg5: memref<1x256xf32, #tpu.memory_space<vmem>>, %arg6: memref<256x128xbf16, #tpu.memory_space<vmem>>, %arg7: memref<1x128xf32, #tpu.memory_space<vmem>>, %arg8: memref<128x128xbf16, #tpu.memory_space<vmem>>, %arg9: memref<1x128xf32, #tpu.memory_space<vmem>>, %arg10: memref<128x128xbf16, #tpu.memory_space<vmem>>, %arg11: memref<1x128xf32, #tpu.memory_space<vmem>>, %arg12: memref<128x128xbf16, #tpu.memory_space<vmem>>, %arg13: memref<1x128xf32, #tpu.memory_space<vmem>>, %arg14: memref<16x128xf32, #tpu.memory_space<vmem>>) attributes {dimension_semantics = [#tpu.dimension_semantics<parallel>], iteration_bounds = array<i64: 1>, scalar_prefetch = 0 : i64, scratch_operands = 0 : i64, tpu.core_type = #tpu.core_type<tc>, window_params = [{transform_indices = @transform_0, window_bounds = array<i64: 16, 784>}, {pipeline_mode = #tpu.pipeline_mode<synchronous>, transform_indices = @transform_1, window_bounds = array<i64: 784, 512>}, {pipeline_mode = #tpu.pipeline_mode<synchronous>, transform_indices = @transform_2, window_bounds = array<i64: 1, 512>}, {pipeline_mode = #tpu.pipeline_mode<synchronous>, transform_indices = @transform_3, window_bounds = array<i64: 512, 256>}, {pipeline_mode = #tpu.pipeline_mode<synchronous>, transform_indices = @transform_4, window_bounds = array<i64: 1, 256>}, {pipeline_mode = #tpu.pipeline_mode<synchronous>, transform_indices = @transform_5, window_bounds = array<i64: 256, 128>}, {pipeline_mode = #tpu.pipeline_mode<synchronous>, transform_indices = @transform_6, window_bounds = array<i64: 1, 128>}, {pipeline_mode = #tpu.pipeline_mode<synchronous>, transform_indices = @transform_7, window_bounds = array<i64: 128, 128>}, {pipeline_mode = #tpu.pipeline_mode<synchronous>, transform_indices = @transform_8, window_bounds = array<i64: 1, 128>}, {pipeline_mode = #tpu.pipeline_mode<synchronous>, transform_indices = @transform_9, window_bounds = array<i64: 128, 128>}, {pipeline_mode = #tpu.pipeline_mode<synchronous>, transform_indices = @transform_10, window_bounds = array<i64: 1, 128>}, {pipeline_mode = #tpu.pipeline_mode<synchronous>, transform_indices = @transform_11, window_bounds = array<i64: 128, 128>}, {pipeline_mode = #tpu.pipeline_mode<synchronous>, transform_indices = @transform_12, window_bounds = array<i64: 1, 128>}, {transform_indices = @transform_13, window_bounds = array<i64: 16, 128>}]} {
    %c0 = arith.constant 0 : index
    %c0_0 = arith.constant 0 : index
    %0 = vector.load %arg1[%c0, %c0_0] : memref<16x784xbf16, #tpu.memory_space<vmem>>, vector<16x784xbf16>
    %c0_1 = arith.constant 0 : index
    %c0_2 = arith.constant 0 : index
    %1 = vector.load %arg2[%c0_1, %c0_2] : memref<784x512xbf16, #tpu.memory_space<vmem>>, vector<784x512xbf16>
    %cst = arith.constant dense<0.000000e+00> : vector<16x512xf32>
    %2 = tpu.matmul %0, %1, %cst {dimension_numbers = #tpu.dot_dimension_numbers<[1], [0], [0], [1], [0, 0, 1, 1], [], []>} : vector<16x784xbf16>, vector<784x512xbf16>, vector<16x512xf32> -> vector<16x512xf32>
    %c0_3 = arith.constant 0 : index
    %c0_4 = arith.constant 0 : index
    %3 = vector.load %arg3[%c0_3, %c0_4] : memref<1x512xf32, #tpu.memory_space<vmem>>, vector<1x512xf32>
    %4 = vector.broadcast %3 : vector<1x512xf32> to vector<16x512xf32>
    %5 = arith.addf %2, %4 : vector<16x512xf32>
    %cst_5 = arith.constant 0.000000e+00 : f32
    %6 = vector.broadcast %cst_5 : f32 to vector<16x512xf32>
    %7 = arith.maximumf %5, %6 : vector<16x512xf32>
    %8 = arith.truncf %7 : vector<16x512xf32> to vector<16x512xbf16>
    %c0_6 = arith.constant 0 : index
    %c0_7 = arith.constant 0 : index
    %9 = vector.load %arg4[%c0_6, %c0_7] : memref<512x256xbf16, #tpu.memory_space<vmem>>, vector<512x256xbf16>
    %cst_8 = arith.constant dense<0.000000e+00> : vector<16x256xf32>
    %10 = tpu.matmul %8, %9, %cst_8 {dimension_numbers = #tpu.dot_dimension_numbers<[1], [0], [0], [1], [0, 0, 1, 1], [], []>} : vector<16x512xbf16>, vector<512x256xbf16>, vector<16x256xf32> -> vector<16x256xf32>
    %c0_9 = arith.constant 0 : index
    %c0_10 = arith.constant 0 : index
    %11 = vector.load %arg5[%c0_9, %c0_10] : memref<1x256xf32, #tpu.memory_space<vmem>>, vector<1x256xf32>
    %12 = vector.broadcast %11 : vector<1x256xf32> to vector<16x256xf32>
    %13 = arith.addf %10, %12 : vector<16x256xf32>
    %cst_11 = arith.constant 0.000000e+00 : f32
    %14 = vector.broadcast %cst_11 : f32 to vector<16x256xf32>
    %15 = arith.maximumf %13, %14 : vector<16x256xf32>
    %16 = arith.truncf %15 : vector<16x256xf32> to vector<16x256xbf16>
    %c0_12 = arith.constant 0 : index
    %c0_13 = arith.constant 0 : index
    %17 = vector.load %arg6[%c0_12, %c0_13] : memref<256x128xbf16, #tpu.memory_space<vmem>>, vector<256x128xbf16>
    %cst_14 = arith.constant dense<0.000000e+00> : vector<16x128xf32>
    %18 = tpu.matmul %16, %17, %cst_14 {dimension_numbers = #tpu.dot_dimension_numbers<[1], [0], [0], [1], [0, 0, 1, 1], [], []>} : vector<16x256xbf16>, vector<256x128xbf16>, vector<16x128xf32> -> vector<16x128xf32>
    %c0_15 = arith.constant 0 : index
    %c0_16 = arith.constant 0 : index
    %19 = vector.load %arg7[%c0_15, %c0_16] : memref<1x128xf32, #tpu.memory_space<vmem>>, vector<1x128xf32>
    %20 = vector.broadcast %19 : vector<1x128xf32> to vector<16x128xf32>
    %21 = arith.addf %18, %20 : vector<16x128xf32>
    %cst_17 = arith.constant 0.000000e+00 : f32
    %22 = vector.broadcast %cst_17 : f32 to vector<16x128xf32>
    %23 = arith.maximumf %21, %22 : vector<16x128xf32>
    %24 = arith.truncf %23 : vector<16x128xf32> to vector<16x128xbf16>
    %c0_18 = arith.constant 0 : index
    %c0_19 = arith.constant 0 : index
    %25 = vector.load %arg8[%c0_18, %c0_19] : memref<128x128xbf16, #tpu.memory_space<vmem>>, vector<128x128xbf16>
    %cst_20 = arith.constant dense<0.000000e+00> : vector<16x128xf32>
    %26 = tpu.matmul %24, %25, %cst_20 {dimension_numbers = #tpu.dot_dimension_numbers<[1], [0], [0], [1], [0, 0, 1, 1], [], []>} : vector<16x128xbf16>, vector<128x128xbf16>, vector<16x128xf32> -> vector<16x128xf32>
    %c0_21 = arith.constant 0 : index
    %c0_22 = arith.constant 0 : index
    %27 = vector.load %arg9[%c0_21, %c0_22] : memref<1x128xf32, #tpu.memory_space<vmem>>, vector<1x128xf32>
    %28 = vector.broadcast %27 : vector<1x128xf32> to vector<16x128xf32>
    %29 = arith.addf %26, %28 : vector<16x128xf32>
    %cst_23 = arith.constant 0.000000e+00 : f32
    %30 = vector.broadcast %cst_23 : f32 to vector<16x128xf32>
    %31 = arith.maximumf %29, %30 : vector<16x128xf32>
    %32 = arith.truncf %31 : vector<16x128xf32> to vector<16x128xbf16>
    %c0_24 = arith.constant 0 : index
    %c0_25 = arith.constant 0 : index
    %33 = vector.load %arg10[%c0_24, %c0_25] : memref<128x128xbf16, #tpu.memory_space<vmem>>, vector<128x128xbf16>
    %cst_26 = arith.constant dense<0.000000e+00> : vector<16x128xf32>
    %34 = tpu.matmul %32, %33, %cst_26 {dimension_numbers = #tpu.dot_dimension_numbers<[1], [0], [0], [1], [0, 0, 1, 1], [], []>} : vector<16x128xbf16>, vector<128x128xbf16>, vector<16x128xf32> -> vector<16x128xf32>
    %c0_27 = arith.constant 0 : index
    %c0_28 = arith.constant 0 : index
    %35 = vector.load %arg11[%c0_27, %c0_28] : memref<1x128xf32, #tpu.memory_space<vmem>>, vector<1x128xf32>
    %36 = vector.broadcast %35 : vector<1x128xf32> to vector<16x128xf32>
    %37 = arith.addf %34, %36 : vector<16x128xf32>
    %cst_29 = arith.constant 0.000000e+00 : f32
    %38 = vector.broadcast %cst_29 : f32 to vector<16x128xf32>
    %39 = arith.maximumf %37, %38 : vector<16x128xf32>
    %40 = arith.truncf %39 : vector<16x128xf32> to vector<16x128xbf16>
    %c0_30 = arith.constant 0 : index
    %c0_31 = arith.constant 0 : index
    %41 = vector.load %arg12[%c0_30, %c0_31] : memref<128x128xbf16, #tpu.memory_space<vmem>>, vector<128x128xbf16>
    %cst_32 = arith.constant dense<0.000000e+00> : vector<16x128xf32>
    %42 = tpu.matmul %40, %41, %cst_32 {dimension_numbers = #tpu.dot_dimension_numbers<[1], [0], [0], [1], [0, 0, 1, 1], [], []>} : vector<16x128xbf16>, vector<128x128xbf16>, vector<16x128xf32> -> vector<16x128xf32>
    %c0_33 = arith.constant 0 : index
    %c0_34 = arith.constant 0 : index
    %43 = vector.load %arg13[%c0_33, %c0_34] : memref<1x128xf32, #tpu.memory_space<vmem>>, vector<1x128xf32>
    %44 = vector.broadcast %43 : vector<1x128xf32> to vector<16x128xf32>
    %45 = arith.addf %42, %44 : vector<16x128xf32>
    %46 = tpu.iota {dimensions = array<i32: 1>} : vector<16x128xi32>
    %c10_i32 = arith.constant 10 : i32
    %47 = vector.broadcast %c10_i32 : i32 to vector<16x128xi32>
    %48 = arith.cmpi slt, %46, %47 : vector<16x128xi32>
    %cst_35 = arith.constant -1.000000e+30 : f32
    %49 = vector.broadcast %cst_35 : f32 to vector<16x128xf32>
    %50 = arith.select %48, %45, %49 : vector<16x128xi1>, vector<16x128xf32>
    %cst_36 = arith.constant dense<0xFF800000> : vector<16xf32>
    %51 = vector.multi_reduction <maximumf>, %50, %cst_36 [1] : vector<16x128xf32> to vector<16xf32>
    %52 = vector.shape_cast %51 : vector<16xf32> to vector<16x1xf32>
    %53 = vector.broadcast %52 : vector<16x1xf32> to vector<16x128xf32>
    %54 = arith.subf %50, %53 : vector<16x128xf32>
    %55 = math.exp %54 : vector<16x128xf32>
    %cst_37 = arith.constant dense<0.000000e+00> : vector<16xf32>
    %56 = vector.multi_reduction <add>, %55, %cst_37 [1] : vector<16x128xf32> to vector<16xf32>
    %57 = vector.shape_cast %56 : vector<16xf32> to vector<16x1xf32>
    %58 = math.log %57 : vector<16x1xf32>
    %59 = vector.broadcast %58 : vector<16x1xf32> to vector<16x128xf32>
    %60 = arith.subf %54, %59 : vector<16x128xf32>
    %c0_38 = arith.constant 0 : index
    %c0_39 = arith.constant 0 : index
    %61 = vector.load %arg14[%c0_38, %c0_39] : memref<16x128xf32, #tpu.memory_space<vmem>>, vector<16x128xf32>
    tpu.vector_store %arg14[%c0_38, %c0_39], %60 {strides = array<i32>} : memref<16x128xf32, #tpu.memory_space<vmem>>, vector<16x128xf32>,
    return
  }
  func.func @transform_0(%arg0: i32) -> (i32, i32) {
    %c0_i32 = arith.constant 0 : i32
    %c0_i32_0 = arith.constant 0 : i32
    return %arg0, %c0_i32 : i32, i32
  }
  func.func @transform_1(%arg0: i32) -> (i32, i32) {
    %c0_i32 = arith.constant 0 : i32
    %c0_i32_0 = arith.constant 0 : i32
    %c0_i32_1 = arith.constant 0 : i32
    return %c0_i32, %c0_i32_0 : i32, i32
  }
  func.func @transform_2(%arg0: i32) -> (i32, i32) {
    %c0_i32 = arith.constant 0 : i32
    %c0_i32_0 = arith.constant 0 : i32
    %c0_i32_1 = arith.constant 0 : i32
    return %c0_i32, %c0_i32_0 : i32, i32
  }
  func.func @transform_3(%arg0: i32) -> (i32, i32) {
    %c0_i32 = arith.constant 0 : i32
    %c0_i32_0 = arith.constant 0 : i32
    %c0_i32_1 = arith.constant 0 : i32
    return %c0_i32, %c0_i32_0 : i32, i32
  }
  func.func @transform_4(%arg0: i32) -> (i32, i32) {
    %c0_i32 = arith.constant 0 : i32
    %c0_i32_0 = arith.constant 0 : i32
    %c0_i32_1 = arith.constant 0 : i32
    return %c0_i32, %c0_i32_0 : i32, i32
  }
  func.func @transform_5(%arg0: i32) -> (i32, i32) {
    %c0_i32 = arith.constant 0 : i32
    %c0_i32_0 = arith.constant 0 : i32
    %c0_i32_1 = arith.constant 0 : i32
    return %c0_i32, %c0_i32_0 : i32, i32
  }
  func.func @transform_6(%arg0: i32) -> (i32, i32) {
    %c0_i32 = arith.constant 0 : i32
    %c0_i32_0 = arith.constant 0 : i32
    %c0_i32_1 = arith.constant 0 : i32
    return %c0_i32, %c0_i32_0 : i32, i32
  }
  func.func @transform_7(%arg0: i32) -> (i32, i32) {
    %c0_i32 = arith.constant 0 : i32
    %c0_i32_0 = arith.constant 0 : i32
    %c0_i32_1 = arith.constant 0 : i32
    return %c0_i32, %c0_i32_0 : i32, i32
  }
  func.func @transform_8(%arg0: i32) -> (i32, i32) {
    %c0_i32 = arith.constant 0 : i32
    %c0_i32_0 = arith.constant 0 : i32
    %c0_i32_1 = arith.constant 0 : i32
    return %c0_i32, %c0_i32_0 : i32, i32
  }
  func.func @transform_9(%arg0: i32) -> (i32, i32) {
    %c0_i32 = arith.constant 0 : i32
    %c0_i32_0 = arith.constant 0 : i32
    %c0_i32_1 = arith.constant 0 : i32
    return %c0_i32, %c0_i32_0 : i32, i32
  }
  func.func @transform_10(%arg0: i32) -> (i32, i32) {
    %c0_i32 = arith.constant 0 : i32
    %c0_i32_0 = arith.constant 0 : i32
    %c0_i32_1 = arith.constant 0 : i32
    return %c0_i32, %c0_i32_0 : i32, i32
  }
  func.func @transform_11(%arg0: i32) -> (i32, i32) {
    %c0_i32 = arith.constant 0 : i32
    %c0_i32_0 = arith.constant 0 : i32
    %c0_i32_1 = arith.constant 0 : i32
    return %c0_i32, %c0_i32_0 : i32, i32
  }
  func.func @transform_12(%arg0: i32) -> (i32, i32) {
    %c0_i32 = arith.constant 0 : i32
    %c0_i32_0 = arith.constant 0 : i32
    %c0_i32_1 = arith.constant 0 : i32
    return %c0_i32, %c0_i32_0 : i32, i32
  }
  func.func @transform_13(%arg0: i32) -> (i32, i32) {
    %c0_i32 = arith.constant 0 : i32
    %c0_i32_0 = arith.constant 0 : i32
    return %arg0, %c0_i32 : i32, i32
  }
}

</mosaic_0001>

<bundles_post_ra>
// kernel: mlp_forward.1
= control target key start
LH: loop header
LB: loop body
LE: loop exit
PB: predicated region body
PF: predicated region fallthrough
CT: control target
= control target key end

     0   :  { %18 = vsyncpa [#allocation3], 0  ;;  %s4214_s0 = inlined_call_operand.vmem [shape: bf16[16,784], index: 0, kind: input, shape index: {}]   ;;  %s4215_s1 = inlined_call_operand.hbm [shape: bf16[784,512], index: 1, kind: input, shape index: {}]   ;;  %s4216_s2 = inlined_call_operand.vmem [shape: f32[1,512], index: 2, kind: input, shape index: {}]   ;;  %s4217_s3 = inlined_call_operand.vmem [shape: bf16[512,256], index: 3, kind: input, shape index: {}]   ;;  %s4218_s4 = inlined_call_operand.vmem [shape: f32[1,256], index: 4, kind: input, shape index: {}]   ;;  %s4219_s5 = inlined_call_operand.hbm [shape: bf16[256,128], index: 5, kind: input, shape index: {}]   ;;  %s4220_s6 = inlined_call_operand.vmem [shape: f32[1,128], index: 6, kind: input, shape index: {}]   ;;  %s4221_s7 = inlined_call_operand.vmem [shape: bf16[128,128], index: 7, kind: input, shape index: {}]   ;;  %s4222_s8 = inlined_call_operand.vmem [shape: f32[1,128], index: 8, kind: input, shape index: {}]   ;;  %s4223_s9 = inlined_call_operand.hbm [shape: bf16[128,128], index: 9, kind: input, shape index: {}]   ;;  %s4224_s10 = inlined_call_operand.vmem [shape: f32[1,128], index: 10, kind: input, shape index: {}]   ;;  %s4225_s11 = inlined_call_operand.hbm [shape: bf16[128,128], index: 11, kind: input, shape index: {}]   ;;  %s4226_s12 = inlined_call_operand.vmem [shape: f32[1,128], index: 12, kind: input, shape index: {}]   ;;  %s4227_s13 = inlined_call_operand.vmem [shape: f32[16,128], index: 13, kind: output, shape index: {}]  }
   0x1   :  { %19 = vsyncpa [#allocation5], 0 }
   0x2   :  { %20 = vsyncpa [#allocation8], 0  ;;  %s3759_s25 = smov [#allocation4]   ;;  %s3665_s29 = scalar_lea.hbm %s4219_s5, 2048 }
   0x3   :  { %s46_s26 = sshll.u32 %s3759_s25, 4  ;;  %p3666_p0 = scmp.ne.s32.totalorder %s4219_s5, %s3665_s29  ;;  %s47_s26 = int_to_ptr.vmem [resolvable:$true] %s46_s26 }
   0x4   :  { %p3669_p1 = scmp.lt.u32.totalorder %s3665_s29, %s4219_s5 }
   0x6   :  { %p3671_p2 = pnand %p3669_p1, %p3666_p0 }
   0x8   :  { %3674 = shalt.err (!%p3671_p2)
}
   0x9   :  { %s3675_s17 = scalar_lea.vmem %s47_s26, 2048  ;;  %p3680_p4 = scmp.lt.s32.totalorder %s47_s26, %s47_s26 }
   0xa   :  { %p3676_p3 = scmp.ne.s32.totalorder %s47_s26, %s3675_s17  ;;  %p3681_p5 = scmp.lt.s32.totalorder %s3675_s17, %s3675_s17 }
   0xc   :  { %p3682_p6 = por %p3681_p5, %p3680_p4 }
   0xe   :  { %p3683_p7 = pnand %p3682_p6, %p3676_p3 }
  0x10   :  { %3686 = shalt.err (!%p3683_p7)
}
  0x11   :  { %s3760_s18 = smov 64   ;;  %s3761_s19 = smov 4  }
  0x12   :  { %52 = dma.hbm_to_vmem [thread:$0]  %s4219_s5, 2048, %s47_s26, [#allocation5], %s3760_s18, %s3760_s18, %s3761_s19  }
  0x13   :  { %s3762_s22 = smov [#allocation2]   ;;  %s3687_s27 = scalar_lea.hbm %s4215_s1, 25088 }
  0x14   :  { %s28_s23 = sshll.u32 %s3762_s22, 4  ;;  %p3688_p8 = scmp.ne.s32.totalorder %s4215_s1, %s3687_s27  ;;  %s29_s23 = int_to_ptr.vmem [resolvable:$true] %s28_s23 }
  0x15   :  { %p3691_p9 = scmp.lt.u32.totalorder %s3687_s27, %s4215_s1 }
  0x17   :  { %p3693_p10 = pnand %p3691_p9, %p3688_p8 }
  0x19   :  { %3696 = shalt.err (!%p3693_p10)
}
  0x1a   :  { %s3697_s15 = scalar_lea.vmem %s29_s23, 25088  ;;  %p3702_p12 = scmp.lt.s32.totalorder %s29_s23, %s29_s23 }
  0x1b   :  { %p3698_p11 = scmp.ne.s32.totalorder %s29_s23, %s3697_s15  ;;  %p3703_p13 = scmp.lt.s32.totalorder %s3697_s15, %s3697_s15 }
  0x1d   :  { %p3704_p0 = por %p3703_p13, %p3702_p12 }
  0x1f   :  { %p3705_p1 = pnand %p3704_p0, %p3698_p11 }
  0x21   :  { %3708 = shalt.err (!%p3705_p1)
}
  0x22   :  { %s3763_s5 = smov 256   ;;  %s3764_s26 = smov 16  }
  0x23   :  { %34 = dma.hbm_to_vmem [thread:$0]  %s4215_s1, 25088, %s29_s23, [#allocation3], %s3763_s5, %s3763_s5, %s3764_s26  }
  0x24   :  { %s3765_s20 = smov [#allocation6]   ;;  %s3766_s22 = smov [#allocation7]  }
  0x25   :  { %s64_s21 = sshll.u32 %s3765_s20, 4  ;;  %s78_s24 = sshll.u32 %s3766_s22, 4  ;;  %s65_s21 = int_to_ptr.vmem [resolvable:$true] %s64_s21  ;;  %s3867_s24 = int_to_ptr.vmem [resolvable:$true] %s78_s24 }
  0x26   :  { %s3709_s28 = scalar_lea.hbm %s4223_s9, 1024 }
  0x27   :  { %p3710_p2 = scmp.ne.s32.totalorder %s4223_s9, %s3709_s28  ;;  %p3713_p3 = scmp.lt.u32.totalorder %s3709_s28, %s4223_s9 }
  0x29   :  { %p3715_p4 = pnand %p3713_p3, %p3710_p2 }
  0x2b   :  { %3718 = shalt.err (!%p3715_p4)
}
  0x2c   :  { %s3719_s1 = scalar_lea.vmem %s65_s21, 1024  ;;  %p3724_p6 = scmp.lt.s32.totalorder %s65_s21, %s65_s21 }
  0x2d   :  { %p3720_p5 = scmp.ne.s32.totalorder %s65_s21, %s3719_s1  ;;  %p3725_p7 = scmp.lt.s32.totalorder %s3719_s1, %s3719_s1 }
  0x2f   :  { %p3726_p8 = por %p3725_p7, %p3724_p6 }
  0x31   :  { %p3727_p9 = pnand %p3726_p8, %p3720_p5 }
  0x33   :  { %3730 = shalt.err (!%p3727_p9)
}
  0x34   :  { %70 = dma.hbm_to_vmem [thread:$0]  %s4223_s9, 1024, %s65_s21, [#allocation5], %s3760_s18, %s3760_s18, %s3761_s19  }
  0x35   :  { %s3731_s17 = scalar_lea.hbm %s4225_s11, 1024 }
  0x36   :  { %p3732_p10 = scmp.ne.s32.totalorder %s4225_s11, %s3731_s17  ;;  %p3735_p11 = scmp.lt.u32.totalorder %s3731_s17, %s4225_s11 }
  0x38   :  { %p3737_p12 = pnand %p3735_p11, %p3732_p10 }
  0x3a   :  { %3740 = shalt.err (!%p3737_p12)
}
  0x3b   :  { %s3741_s28 = scalar_lea.vmem %s3867_s24, 1024  ;;  %p3746_p0 = scmp.lt.s32.totalorder %s3867_s24, %s3867_s24 }
  0x3c   :  { %p3742_p13 = scmp.ne.s32.totalorder %s3867_s24, %s3741_s28  ;;  %p3747_p1 = scmp.lt.s32.totalorder %s3741_s28, %s3741_s28 }
  0x3e   :  { %p3748_p2 = por %p3747_p1, %p3746_p0 }
  0x40   :  { %p3749_p3 = pnand %p3748_p2, %p3742_p13 }
  0x42   :  { %3752 = shalt.err (!%p3749_p3)
}
  0x43   :  { %84 = dma.hbm_to_vmem [thread:$0]  %s4225_s11, 1024, %s3867_s24, [#allocation8], %s3760_s18, %s3760_s18, %s3761_s19  }
  0x44   :  { %3753 = dma.done.wait [#allocation3], 25088  }
  0x45   :  { %3754 = vsyncadd [#allocation3], 4294942208 }
  0x46   :  { %3755 = dma.done.wait [#allocation5], 3072  }
  0x47   :  { %3756 = vsyncadd [#allocation5], 4294964224 }
  0x48   :  { %3757 = dma.done.wait [#allocation8], 1024  }
  0x49   :  { %3758 = vsyncadd [#allocation8], 4294966272  ;;  %v3217_v0 = vld [vmem:[#allocation2 + $0x4] ss:$16 sps:$4 sm:$0xff]   ;;  %v3219_v1 = vld [vmem:[#allocation2 + $0xc] ss:$16 sps:$4 sm:$0xff]  }
  0x4a   :  { %1345 = vmatprep.subr.bf16.mxu0 %v3217_v0  ;;  %v3221_v2 = vld [vmem:[#allocation2] ss:$16 sps:$4 sm:$0xff]   ;;  %v3222_v3 = vld [vmem:[#allocation2 + $0x8] ss:$16 sps:$4 sm:$0xff]   ;;  %1517 = vmatprep.subr.bf16.mxu1 %v3219_v1  ;;  %v3223_v4 = vld [vmem:[#allocation2 + $0x24] ss:$16 sps:$4 sm:$0xff]  }
  0x4b   :  { %1346 = vmatpush1.bf16.msra.mxu0 %v3221_v2  ;;  %1518 = vmatpush1.bf16.msra.mxu1 %v3222_v3  ;;  %v3225_v5 = vld [vmem:[#allocation2 + $0x2c] ss:$16 sps:$4 sm:$0xff]   ;;  %v3227_v6 = vld [vmem:[#allocation2 + $0x20] ss:$16 sps:$4 sm:$0xff]   ;;  %v3228_v7 = vld [vmem:[#allocation2 + $0x28] ss:$16 sps:$4 sm:$0xff]  }
  0x4c   :  { %1347 = vmatprep.subr.bf16.mxu0 %v3223_v4  ;;  %1519 = vmatprep.subr.bf16.mxu1 %v3225_v5  ;;  %v3229_v8 = vld [vmem:[#allocation2 + $0x44] ss:$16 sps:$4 sm:$0xff]   ;;  %v3231_v9 = vld [vmem:[#allocation2 + $0x4c] ss:$16 sps:$4 sm:$0xff]   ;;  %v3233_v10 = vld [vmem:[#allocation2 + $0x40] ss:$16 sps:$4 sm:$0xff]  }
  0x4d   :  { %v3234_v11 = vld [vmem:[#allocation2 + $0x48] ss:$16 sps:$4 sm:$0xff]   ;;  %v3235_v12 = vld [vmem:[#allocation2 + $0x64] ss:$16 sps:$4 sm:$0xff]   ;;  %v3237_v13 = vld [vmem:[#allocation2 + $0x6c] ss:$16 sps:$4 sm:$0xff]  }
  0x4e   :  { %v3239_v14 = vld [vmem:[#allocation2 + $0x60] ss:$16 sps:$4 sm:$0xff]   ;;  %v3240_v15 = vld [vmem:[#allocation2 + $0x68] ss:$16 sps:$4 sm:$0xff]   ;;  %v3241_v16 = vld [vmem:[#allocation2 + $0x84] ss:$16 sps:$4 sm:$0xff]  }
  0x4f   :  { %1348 = vmatpush1.bf16.msra.mxu0 %v3227_v6  ;;  %1520 = vmatpush1.bf16.msra.mxu1 %v3228_v7  ;;  %v3243_v17 = vld [vmem:[#allocation2 + $0x8c] ss:$16 sps:$4 sm:$0xff]   ;;  %v3245_v18 = vld [vmem:[#allocation2 + $0x80] ss:$16 sps:$4 sm:$0xff]   ;;  %v3246_v19 = vld [vmem:[#allocation2 + $0x88] ss:$16 sps:$4 sm:$0xff]  }
  0x50   :  { %1349 = vmatprep.subr.bf16.mxu0 %v3229_v8  ;;  %1521 = vmatprep.subr.bf16.mxu1 %v3231_v9  ;;  %v3247_v20 = vld [vmem:[#allocation2 + $0xa4] ss:$16 sps:$4 sm:$0xff]   ;;  %v3249_v21 = vld [vmem:[#allocation2 + $0xac] ss:$16 sps:$4 sm:$0xff]   ;;  %v3251_v22 = vld [vmem:[#allocation2 + $0xa0] ss:$16 sps:$4 sm:$0xff]  }
  0x51   :  { %v3252_v23 = vld [vmem:[#allocation2 + $0xa8] ss:$16 sps:$4 sm:$0xff]   ;;  %v3253_v24 = vld [vmem:[#allocation2 + $0xc4] ss:$16 sps:$4 sm:$0xff]   ;;  %v3255_v25 = vld [vmem:[#allocation2 + $0xcc] ss:$16 sps:$4 sm:$0xff]  }
  0x52   :  { %v3257_v26 = vld [vmem:[#allocation2 + $0xc0] ss:$16 sps:$4 sm:$0xff]   ;;  %v3258_v27 = vld [vmem:[#allocation2 + $0xc8] ss:$16 sps:$4 sm:$0xff]   ;;  %v3259_v28 = vld [vmem:[#allocation2 + $0xe4] ss:$16 sps:$4 sm:$0xff]  }
  0x53   :  { %1350 = vmatpush1.bf16.msra.mxu0 %v3233_v10  ;;  %1522 = vmatpush1.bf16.msra.mxu1 %v3234_v11  ;;  %v3261_v29 = vld [vmem:[#allocation2 + $0xec] ss:$16 sps:$4 sm:$0xff]   ;;  %v3263_v30 = vld [vmem:[#allocation2 + $0xe0] ss:$16 sps:$4 sm:$0xff]   ;;  %v3264_v31 = vld [vmem:[#allocation2 + $0xe8] ss:$16 sps:$4 sm:$0xff]  }
  0x54   :  { %1351 = vmatprep.subr.bf16.mxu0 %v3235_v12  ;;  %1523 = vmatprep.subr.bf16.mxu1 %v3237_v13  ;;  %v3265_v32 = vld [vmem:[#allocation2 + $0x104] ss:$16 sps:$4 sm:$0xff]   ;;  %v3267_v33 = vld [vmem:[#allocation2 + $0x10c] ss:$16 sps:$4 sm:$0xff]   ;;  %v3269_v34 = vld [vmem:[#allocation2 + $0x100] ss:$16 sps:$4 sm:$0xff]  }
  0x55   :  { %v3270_v35 = vld [vmem:[#allocation2 + $0x108] ss:$16 sps:$4 sm:$0xff]   ;;  %v3271_v36 = vld [vmem:[#allocation2 + $0x124] ss:$16 sps:$4 sm:$0xff]   ;;  %v3273_v37 = vld [vmem:[#allocation2 + $0x12c] ss:$16 sps:$4 sm:$0xff]  }
  0x56   :  { %v3275_v38 = vld [vmem:[#allocation2 + $0x120] ss:$16 sps:$4 sm:$0xff]   ;;  %v3276_v39 = vld [vmem:[#allocation2 + $0x128] ss:$16 sps:$4 sm:$0xff]   ;;  %v3277_v40 = vld [vmem:[#allocation2 + $0x144] ss:$16 sps:$4 sm:$0xff]  }
  0x57   :  { %1352 = vmatpush1.bf16.msra.mxu0 %v3239_v14  ;;  %1524 = vmatpush1.bf16.msra.mxu1 %v3240_v15  ;;  %v3279_v41 = vld [vmem:[#allocation2 + $0x14c] ss:$16 sps:$4 sm:$0xff]   ;;  %v3281_v42 = vld [vmem:[#allocation2 + $0x140] ss:$16 sps:$4 sm:$0xff]   ;;  %v3282_v43 = vld [vmem:[#allocation2 + $0x148] ss:$16 sps:$4 sm:$0xff]  }
  0x58   :  { %1353 = vmatprep.subr.bf16.mxu0 %v3241_v16  ;;  %1525 = vmatprep.subr.bf16.mxu1 %v3243_v17  ;;  %v3283_v44 = vld [vmem:[#allocation2 + $0x164] ss:$16 sps:$4 sm:$0xff]   ;;  %v3285_v45 = vld [vmem:[#allocation2 + $0x16c] ss:$16 sps:$4 sm:$0xff]   ;;  %v3287_v46 = vld [vmem:[#allocation2 + $0x160] ss:$16 sps:$4 sm:$0xff]  }
  0x59   :  { %v3288_v47 = vld [vmem:[#allocation2 + $0x168] ss:$16 sps:$4 sm:$0xff]   ;;  %v3315_v48 = vld [vmem:[%s4214_s0 + $0x4] ss:$28 sps:$4 sm:$0xff]   ;;  %v3291_v50 = vld [vmem:[#allocation2 + $0x18c] ss:$16 sps:$4 sm:$0xff]  }
  0x5a   :  { %v3289_v49 = vld [vmem:[#allocation2 + $0x184] ss:$16 sps:$4 sm:$0xff]   ;;  %1377 = vmatprep.mubr.bf16.mxu0 %v3315_v48  ;;  %1549 = vmatprep.mubr.bf16.mxu1 %v3315_v48  ;;  %v3293_v51 = vld [vmem:[#allocation2 + $0x180] ss:$16 sps:$4 sm:$0xff]   ;;  %v3294_v52 = vld [vmem:[#allocation2 + $0x188] ss:$16 sps:$4 sm:$0xff]  }
  0x5b   :  { %1354 = vmatpush1.bf16.msra.mxu0 %v3245_v18  ;;  %1526 = vmatpush1.bf16.msra.mxu1 %v3246_v19  ;;  %v3295_v53 = vld [vmem:[#allocation2 + $0x1a4] ss:$16 sps:$4 sm:$0xff]   ;;  %v3297_v54 = vld [vmem:[#allocation2 + $0x1ac] ss:$16 sps:$4 sm:$0xff]   ;;  %v3299_v55 = vld [vmem:[#allocation2 + $0x1a0] ss:$16 sps:$4 sm:$0xff]  }
  0x5c   :  { %1355 = vmatprep.subr.bf16.mxu0 %v3247_v20  ;;  %1527 = vmatprep.subr.bf16.mxu1 %v3249_v21  ;;  %v3300_v56 = vld [vmem:[#allocation2 + $0x1a8] ss:$16 sps:$4 sm:$0xff]   ;;  %v3301_v57 = vld [vmem:[#allocation2 + $0x1c4] ss:$16 sps:$4 sm:$0xff]   ;;  %v3303_v58 = vld [vmem:[#allocation2 + $0x1cc] ss:$16 sps:$4 sm:$0xff]  }
  0x5d   :  { %v3305_v59 = vld [vmem:[#allocation2 + $0x1c0] ss:$16 sps:$4 sm:$0xff]   ;;  %v3306_v60 = vld [vmem:[#allocation2 + $0x1c8] ss:$16 sps:$4 sm:$0xff]   ;;  %v3307_v61 = vld [vmem:[#allocation2 + $0x1e4] ss:$16 sps:$4 sm:$0xff]  }
  0x5e   :  { %v3309_v62 = vld [vmem:[#allocation2 + $0x1ec] ss:$16 sps:$4 sm:$0xff]   ;;  %v3311_v63 = vld [vmem:[#allocation2 + $0x1e0] ss:$16 sps:$4 sm:$0xff]   ;;  %v3312_v0 = vld [vmem:[#allocation2 + $0x1e8] ss:$16 sps:$4 sm:$0xff]  }
  0x5f   :  { %1356 = vmatpush1.bf16.msra.mxu0 %v3251_v22  ;;  %1528 = vmatpush1.bf16.msra.mxu1 %v3252_v23  ;;  %v3318_v1 = vld [vmem:[#allocation2 + $0x204] ss:$16 sps:$4 sm:$0xff]   ;;  %v3321_v2 = vld [vmem:[#allocation2 + $0x20c] ss:$16 sps:$4 sm:$0xff]   ;;  %v3316_v4 = vld [vmem:[#allocation2 + $0x200] ss:$16 sps:$4 sm:$0xff]  }
  0x60   :  { %1357 = vmatprep.subr.bf16.mxu0 %v3253_v24  ;;  %1529 = vmatprep.subr.bf16.mxu1 %v3255_v25  ;;  %v3313_v3 = vld [vmem:[%s4214_s0] ss:$28 sps:$4 sm:$0xff]   ;;  %v3319_v5 = vld [vmem:[#allocation2 + $0x208] ss:$16 sps:$4 sm:$0xff]   ;;  %v3324_v6 = vld [vmem:[#allocation2 + $0x224] ss:$16 sps:$4 sm:$0xff]  }
  0x61   :  { %v3327_v7 = vld [vmem:[#allocation2 + $0x22c] ss:$16 sps:$4 sm:$0xff]   ;;  %v3322_v8 = vld [vmem:[#allocation2 + $0x220] ss:$16 sps:$4 sm:$0xff]   ;;  %v3325_v9 = vld [vmem:[#allocation2 + $0x228] ss:$16 sps:$4 sm:$0xff]  }
  0x62   :  { %v3330_v10 = vld [vmem:[#allocation2 + $0x244] ss:$16 sps:$4 sm:$0xff]   ;;  %v3333_v11 = vld [vmem:[#allocation2 + $0x24c] ss:$16 sps:$4 sm:$0xff]   ;;  %v3328_v12 = vld [vmem:[#allocation2 + $0x240] ss:$16 sps:$4 sm:$0xff]  }
  0x63   :  { %1358 = vmatpush1.bf16.msra.mxu0 %v3257_v26  ;;  %1530 = vmatpush1.bf16.msra.mxu1 %v3258_v27  ;;  %v3331_v13 = vld [vmem:[#allocation2 + $0x248] ss:$16 sps:$4 sm:$0xff]   ;;  %v3336_v14 = vld [vmem:[#allocation2 + $0x264] ss:$16 sps:$4 sm:$0xff]   ;;  %v3339_v15 = vld [vmem:[#allocation2 + $0x26c] ss:$16 sps:$4 sm:$0xff]  }
  0x64   :  { %1359 = vmatprep.subr.bf16.mxu0 %v3259_v28  ;;  %1531 = vmatprep.subr.bf16.mxu1 %v3261_v29  ;;  %v3334_v16 = vld [vmem:[#allocation2 + $0x260] ss:$16 sps:$4 sm:$0xff]   ;;  %v3337_v17 = vld [vmem:[#allocation2 + $0x268] ss:$16 sps:$4 sm:$0xff]   ;;  %v3342_v18 = vld [vmem:[#allocation2 + $0x284] ss:$16 sps:$4 sm:$0xff]  }
  0x65   :  { %v3345_v19 = vld [vmem:[#allocation2 + $0x28c] ss:$16 sps:$4 sm:$0xff]   ;;  %v3340_v20 = vld [vmem:[#allocation2 + $0x280] ss:$16 sps:$4 sm:$0xff]   ;;  %v3343_v21 = vld [vmem:[#allocation2 + $0x288] ss:$16 sps:$4 sm:$0xff]  }
  0x66   :  { %v3348_v22 = vld [vmem:[#allocation2 + $0x2a4] ss:$16 sps:$4 sm:$0xff]   ;;  %v3351_v23 = vld [vmem:[#allocation2 + $0x2ac] ss:$16 sps:$4 sm:$0xff]   ;;  %v3346_v24 = vld [vmem:[#allocation2 + $0x2a0] ss:$16 sps:$4 sm:$0xff]  }
  0x67   :  { %1360 = vmatpush1.bf16.msra.mxu0 %v3263_v30  ;;  %1532 = vmatpush1.bf16.msra.mxu1 %v3264_v31  ;;  %v3349_v25 = vld [vmem:[#allocation2 + $0x2a8] ss:$16 sps:$4 sm:$0xff]   ;;  %v3354_v26 = vld [vmem:[#allocation2 + $0x2c4] ss:$16 sps:$4 sm:$0xff]   ;;  %v3357_v27 = vld [vmem:[#allocation2 + $0x2cc] ss:$16 sps:$4 sm:$0xff]  }
  0x68   :  { %1361 = vmatprep.subr.bf16.mxu0 %v3265_v32  ;;  %1533 = vmatprep.subr.bf16.mxu1 %v3267_v33  ;;  %v3352_v28 = vld [vmem:[#allocation2 + $0x2c0] ss:$16 sps:$4 sm:$0xff]   ;;  %v3355_v29 = vld [vmem:[#allocation2 + $0x2c8] ss:$16 sps:$4 sm:$0xff]   ;;  %v3360_v31 = vld [vmem:[#allocation2 + $0x2e4] ss:$16 sps:$4 sm:$0xff]  }
  0x69   :  { %v3414_v30 = vld [vmem:[%s4214_s0 + $0xc] ss:$28 sps:$4 sm:$0xff]   ;;  %v3358_v33 = vld [vmem:[#allocation2 + $0x2e0] ss:$16 sps:$4 sm:$0xff]   ;;  %vm1341_vm0 = vcmask 130048   ;;  %vm3769_vm1 = vmmov 0  }
  0x6a   :  { %v3363_v32 = vld [vmem:[#allocation2 + $0x2ec] ss:$16 sps:$4 sm:$0xff]  }
  0x6b   :  { %1362 = vmatpush1.bf16.msra.mxu0 %v3269_v34  ;;  %1534 = vmatpush1.bf16.msra.mxu1 %v3270_v35  ;;  %v3361_v34 = vld [vmem:[#allocation2 + $0x2e8] ss:$16 sps:$4 sm:$0xff]   ;;  %v3366_v35 = vld [vmem:[#allocation2 + $0x304] ss:$16 sps:$4 sm:$0xff]   ;;  %v3387_v48 = vld [vmem:[#allocation2 + $0x36c] ss:$16 sps:$4 sm:$0xff]  }
  0x6c   :  { %1363 = vmatprep.subr.bf16.mxu0 %v3271_v36  ;;  %1535 = vmatprep.subr.bf16.mxu1 %v3273_v37  ;;  %v3369_v36 = vld [vmem:[#allocation2 + $0x30c] ss:$16 sps:$4 sm:$0xff]   ;;  %v3364_v37 = vld [vmem:[#allocation2 + $0x300] ss:$16 sps:$4 sm:$0xff]  }
  0x6f   :  { %1364 = vmatpush1.bf16.msra.mxu0 %v3275_v38  ;;  %1536 = vmatpush1.bf16.msra.mxu1 %v3276_v39  ;;  %v3367_v38 = vld [vmem:[#allocation2 + $0x308] ss:$16 sps:$4 sm:$0xff]   ;;  %v3372_v39 = vld [vmem:[#allocation2 + $0x324] ss:$16 sps:$4 sm:$0xff]  }
  0x70   :  { %1365 = vmatprep.subr.bf16.mxu0 %v3277_v40  ;;  %1537 = vmatprep.subr.bf16.mxu1 %v3279_v41  ;;  %v3375_v40 = vld [vmem:[#allocation2 + $0x32c] ss:$16 sps:$4 sm:$0xff]   ;;  %v3370_v41 = vld [vmem:[#allocation2 + $0x320] ss:$16 sps:$4 sm:$0xff]  }
  0x73   :  { %1366 = vmatpush1.bf16.msra.mxu0 %v3281_v42  ;;  %1538 = vmatpush1.bf16.msra.mxu1 %v3282_v43  ;;  %v3373_v42 = vld [vmem:[#allocation2 + $0x328] ss:$16 sps:$4 sm:$0xff]   ;;  %v3378_v43 = vld [vmem:[#allocation2 + $0x344] ss:$16 sps:$4 sm:$0xff]  }
  0x74   :  { %1367 = vmatprep.subr.bf16.mxu0 %v3283_v44  ;;  %1539 = vmatprep.subr.bf16.mxu1 %v3285_v45  ;;  %v3381_v44 = vld [vmem:[#allocation2 + $0x34c] ss:$16 sps:$4 sm:$0xff]   ;;  %v3376_v45 = vld [vmem:[#allocation2 + $0x340] ss:$16 sps:$4 sm:$0xff]  }
  0x77   :  { %1368 = vmatpush1.bf16.msra.mxu0 %v3287_v46  ;;  %1540 = vmatpush1.bf16.msra.mxu1 %v3288_v47  ;;  %v3379_v46 = vld [vmem:[#allocation2 + $0x348] ss:$16 sps:$4 sm:$0xff]   ;;  %v3384_v47 = vld [vmem:[#allocation2 + $0x364] ss:$16 sps:$4 sm:$0xff]  }
  0x78   :  { %1369 = vmatprep.subr.bf16.mxu0 %v3289_v49  ;;  %1541 = vmatprep.subr.bf16.mxu1 %v3291_v50  ;;  %v3382_v49 = vld [vmem:[#allocation2 + $0x360] ss:$16 sps:$4 sm:$0xff]   ;;  %v3385_v50 = vld [vmem:[#allocation2 + $0x368] ss:$16 sps:$4 sm:$0xff]  }
  0x7b   :  { %1370 = vmatpush1.bf16.msra.mxu0 %v3293_v51  ;;  %1542 = vmatpush1.bf16.msra.mxu1 %v3294_v52  ;;  %v3390_v51 = vld [vmem:[#allocation2 + $0x384] ss:$16 sps:$4 sm:$0xff]   ;;  %v3393_v52 = vld [vmem:[#allocation2 + $0x38c] ss:$16 sps:$4 sm:$0xff]  }
  0x7c   :  { %1371 = vmatprep.subr.bf16.mxu0 %v3295_v53  ;;  %1543 = vmatprep.subr.bf16.mxu1 %v3297_v54  ;;  %v3388_v53 = vld [vmem:[#allocation2 + $0x380] ss:$16 sps:$4 sm:$0xff]   ;;  %v3391_v54 = vld [vmem:[#allocation2 + $0x388] ss:$16 sps:$4 sm:$0xff]  }
  0x7f   :  { %1372 = vmatpush1.bf16.msra.mxu0 %v3299_v55  ;;  %1544 = vmatpush1.bf16.msra.mxu1 %v3300_v56  ;;  %v3396_v55 = vld [vmem:[#allocation2 + $0x3a4] ss:$16 sps:$4 sm:$0xff]   ;;  %v3399_v56 = vld [vmem:[#allocation2 + $0x3ac] ss:$16 sps:$4 sm:$0xff]  }
  0x80   :  { %1373 = vmatprep.subr.bf16.mxu0 %v3301_v57  ;;  %1545 = vmatprep.subr.bf16.mxu1 %v3303_v58  ;;  %v3394_v57 = vld [vmem:[#allocation2 + $0x3a0] ss:$16 sps:$4 sm:$0xff]   ;;  %v3397_v58 = vld [vmem:[#allocation2 + $0x3a8] ss:$16 sps:$4 sm:$0xff]  }
  0x83   :  { %1374 = vmatpush1.bf16.msra.mxu0 %v3305_v59  ;;  %1546 = vmatpush1.bf16.msra.mxu1 %v3306_v60  ;;  %v3402_v59 = vld [vmem:[#allocation2 + $0x3c4] ss:$16 sps:$4 sm:$0xff]   ;;  %v3405_v60 = vld [vmem:[#allocation2 + $0x3cc] ss:$16 sps:$4 sm:$0xff]  }
  0x84   :  { %1375 = vmatprep.subr.bf16.mxu0 %v3307_v61  ;;  %1547 = vmatprep.subr.bf16.mxu1 %v3309_v62  ;;  %v3400_v61 = vld [vmem:[#allocation2 + $0x3c0] ss:$16 sps:$4 sm:$0xff]   ;;  %v3403_v62 = vld [vmem:[#allocation2 + $0x3c8] ss:$16 sps:$4 sm:$0xff]  }
  0x87   :  { %1376 = vmatpush1.bf16.msra.mxu0 %v3311_v63  ;;  %1548 = vmatpush1.bf16.msra.mxu1 %v3312_v0  ;;  %v3408_v63 = vld [vmem:[#allocation2 + $0x3e4] ss:$16 sps:$4 sm:$0xff]   ;;  %v3411_v0 = vld [vmem:[#allocation2 + $0x3ec] ss:$16 sps:$4 sm:$0xff]  }
  0x88   :  { %1388 = vmatprep.subr.bf16.mxu0 %v3318_v1  ;;  %1560 = vmatprep.subr.bf16.mxu1 %v3321_v2  ;;  %v3406_v1 = vld [vmem:[#allocation2 + $0x3e0] ss:$16 sps:$4 sm:$0xff]   ;;  %v3409_v2 = vld [vmem:[#allocation2 + $0x3e8] ss:$16 sps:$4 sm:$0xff]  }
  0x8a   :  { %1378 = vmatmul.mubr.bf16.vlgmr.msra.gmra.mrb[0].mxu0 %v3313_v3  ;;  %1550 = vmatmul.mubr.bf16.vlgmr.msra.gmra.mrb[0].mxu1 %v3313_v3  ;;  %v3417_v3 = vld [vmem:[#allocation2 + $0x404] ss:$16 sps:$4 sm:$0xff]  }
  0x8b   :  { %1389 = vmatpush1.bf16.msra.mxu0 %v3316_v4  ;;  %1561 = vmatpush1.bf16.msra.mxu1 %v3319_v5  ;;  %v3420_v4 = vld [vmem:[#allocation2 + $0x40c] ss:$16 sps:$4 sm:$0xff]   ;;  %v3412_v5 = vld [vmem:[%s4214_s0 + $0x8] ss:$28 sps:$4 sm:$0xff]  }
  0x8c   :  { %1390 = vmatprep.subr.bf16.mxu0 %v3324_v6  ;;  %1562 = vmatprep.subr.bf16.mxu1 %v3327_v7  ;;  %v3415_v6 = vld [vmem:[#allocation2 + $0x400] ss:$16 sps:$4 sm:$0xff]   ;;  %v3418_v7 = vld [vmem:[#allocation2 + $0x408] ss:$16 sps:$4 sm:$0xff]  }
  0x8d   :  { %1420 = vmatprep.mubr.bf16.mxu0 %v3414_v30  ;;  %1592 = vmatprep.mubr.bf16.mxu1 %v3414_v30  ;;  %v3456_v30 = vld [vmem:[#allocation2 + $0x4cc] ss:$16 sps:$4 sm:$0xff]  }
  0x8f   :  { %1391 = vmatpush1.bf16.msra.mxu0 %v3322_v8  ;;  %1563 = vmatpush1.bf16.msra.mxu1 %v3325_v9  ;;  %v3423_v8 = vld [vmem:[#allocation2 + $0x424] ss:$16 sps:$4 sm:$0xff]   ;;  %v3426_v9 = vld [vmem:[#allocation2 + $0x42c] ss:$16 sps:$4 sm:$0xff]  }
  0x90   :  { %1392 = vmatprep.subr.bf16.mxu0 %v3330_v10  ;;  %1564 = vmatprep.subr.bf16.mxu1 %v3333_v11  ;;  %v3421_v10 = vld [vmem:[#allocation2 + $0x420] ss:$16 sps:$4 sm:$0xff]   ;;  %v3424_v11 = vld [vmem:[#allocation2 + $0x428] ss:$16 sps:$4 sm:$0xff]  }
  0x93   :  { %1393 = vmatpush1.bf16.msra.mxu0 %v3328_v12  ;;  %1565 = vmatpush1.bf16.msra.mxu1 %v3331_v13  ;;  %v3513_v12 = vld [vmem:[%s4214_s0 + $0x14] ss:$28 sps:$4 sm:$0xff]  }
  0x94   :  { %1394 = vmatprep.subr.bf16.mxu0 %v3336_v14  ;;  %1566 = vmatprep.subr.bf16.mxu1 %v3339_v15  ;;  %v3429_v13 = vld [vmem:[#allocation2 + $0x444] ss:$16 sps:$4 sm:$0xff]   ;;  %v3432_v14 = vld [vmem:[#allocation2 + $0x44c] ss:$16 sps:$4 sm:$0xff]   ;;  %v3427_v15 = vld [vmem:[#allocation2 + $0x440] ss:$16 sps:$4 sm:$0xff]  }
  0x97   :  { %1395 = vmatpush1.bf16.msra.mxu0 %v3334_v16  ;;  %1567 = vmatpush1.bf16.msra.mxu1 %v3337_v17  ;;  %v3430_v16 = vld [vmem:[#allocation2 + $0x448] ss:$16 sps:$4 sm:$0xff]   ;;  %v3435_v17 = vld [vmem:[#allocation2 + $0x464] ss:$16 sps:$4 sm:$0xff]  }
  0x98   :  { %1396 = vmatprep.subr.bf16.mxu0 %v3342_v18  ;;  %1568 = vmatprep.subr.bf16.mxu1 %v3345_v19  ;;  %v3438_v18 = vld [vmem:[#allocation2 + $0x46c] ss:$16 sps:$4 sm:$0xff]   ;;  %v3433_v19 = vld [vmem:[#allocation2 + $0x460] ss:$16 sps:$4 sm:$0xff]  }
  0x9b   :  { %1397 = vmatpush1.bf16.msra.mxu0 %v3340_v20  ;;  %1569 = vmatpush1.bf16.msra.mxu1 %v3343_v21  ;;  %v3436_v20 = vld [vmem:[#allocation2 + $0x468] ss:$16 sps:$4 sm:$0xff]   ;;  %v3441_v21 = vld [vmem:[#allocation2 + $0x484] ss:$16 sps:$4 sm:$0xff]  }
  0x9c   :  { %1398 = vmatprep.subr.bf16.mxu0 %v3348_v22  ;;  %1570 = vmatprep.subr.bf16.mxu1 %v3351_v23  ;;  %v3444_v22 = vld [vmem:[#allocation2 + $0x48c] ss:$16 sps:$4 sm:$0xff]   ;;  %v3439_v23 = vld [vmem:[#allocation2 + $0x480] ss:$16 sps:$4 sm:$0xff]  }
  0x9f   :  { %1399 = vmatpush1.bf16.msra.mxu0 %v3346_v24  ;;  %1571 = vmatpush1.bf16.msra.mxu1 %v3349_v25  ;;  %v3442_v24 = vld [vmem:[#allocation2 + $0x488] ss:$16 sps:$4 sm:$0xff]   ;;  %v3447_v25 = vld [vmem:[#allocation2 + $0x4a4] ss:$16 sps:$4 sm:$0xff]  }
  0xa0   :  { %1400 = vmatprep.subr.bf16.mxu0 %v3354_v26  ;;  %1572 = vmatprep.subr.bf16.mxu1 %v3357_v27  ;;  %v3450_v26 = vld [vmem:[#allocation2 + $0x4ac] ss:$16 sps:$4 sm:$0xff]   ;;  %v3445_v27 = vld [vmem:[#allocation2 + $0x4a0] ss:$16 sps:$4 sm:$0xff]  }
  0xa3   :  { %1401 = vmatpush1.bf16.msra.mxu0 %v3352_v28  ;;  %1573 = vmatpush1.bf16.msra.mxu1 %v3355_v29  ;;  %v3448_v28 = vld [vmem:[#allocation2 + $0x4a8] ss:$16 sps:$4 sm:$0xff]   ;;  %v3453_v29 = vld [vmem:[#allocation2 + $0x4c4] ss:$16 sps:$4 sm:$0xff]  }
  0xa4   :  { %1402 = vmatprep.subr.bf16.mxu0 %v3360_v31  ;;  %1574 = vmatprep.subr.bf16.mxu1 %v3363_v32  ;;  %v3451_v31 = vld [vmem:[#allocation2 + $0x4c0] ss:$16 sps:$4 sm:$0xff]   ;;  %v3454_v32 = vld [vmem:[#allocation2 + $0x4c8] ss:$16 sps:$4 sm:$0xff]  }
  0xa7   :  { %1403 = vmatpush1.bf16.msra.mxu0 %v3358_v33  ;;  %1575 = vmatpush1.bf16.msra.mxu1 %v3361_v34  ;;  %v3459_v33 = vld [vmem:[#allocation2 + $0x4e4] ss:$16 sps:$4 sm:$0xff]   ;;  %v3462_v34 = vld [vmem:[#allocation2 + $0x4ec] ss:$16 sps:$4 sm:$0xff]  }
  0xa8   :  { %1404 = vmatprep.subr.bf16.mxu0 %v3366_v35  ;;  %1576 = vmatprep.subr.bf16.mxu1 %v3369_v36  ;;  %v3457_v35 = vld [vmem:[#allocation2 + $0x4e0] ss:$16 sps:$4 sm:$0xff]   ;;  %v3460_v36 = vld [vmem:[#allocation2 + $0x4e8] ss:$16 sps:$4 sm:$0xff]  }
  0xab   :  { %1405 = vmatpush1.bf16.msra.mxu0 %v3364_v37  ;;  %1577 = vmatpush1.bf16.msra.mxu1 %v3367_v38  ;;  %v3465_v37 = vld [vmem:[#allocation2 + $0x504] ss:$16 sps:$4 sm:$0xff]   ;;  %v3468_v38 = vld [vmem:[#allocation2 + $0x50c] ss:$16 sps:$4 sm:$0xff]  }
  0xac   :  { %1406 = vmatprep.subr.bf16.mxu0 %v3372_v39  ;;  %1578 = vmatprep.subr.bf16.mxu1 %v3375_v40  ;;  %v3463_v39 = vld [vmem:[#allocation2 + $0x500] ss:$16 sps:$4 sm:$0xff]   ;;  %v3466_v40 = vld [vmem:[#allocation2 + $0x508] ss:$16 sps:$4 sm:$0xff]  }
  0xaf   :  { %1407 = vmatpush1.bf16.msra.mxu0 %v3370_v41  ;;  %1579 = vmatpush1.bf16.msra.mxu1 %v3373_v42  ;;  %v3471_v41 = vld [vmem:[#allocation2 + $0x524] ss:$16 sps:$4 sm:$0xff]   ;;  %v3474_v42 = vld [vmem:[#allocation2 + $0x52c] ss:$16 sps:$4 sm:$0xff]  }
  0xb0   :  { %1408 = vmatprep.subr.bf16.mxu0 %v3378_v43  ;;  %1580 = vmatprep.subr.bf16.mxu1 %v3381_v44  ;;  %v3469_v43 = vld [vmem:[#allocation2 + $0x520] ss:$16 sps:$4 sm:$0xff]   ;;  %v3472_v44 = vld [vmem:[#allocation2 + $0x528] ss:$16 sps:$4 sm:$0xff]  }
  0xb3   :  { %1409 = vmatpush1.bf16.msra.mxu0 %v3376_v45  ;;  %1581 = vmatpush1.bf16.msra.mxu1 %v3379_v46  ;;  %v3477_v45 = vld [vmem:[#allocation2 + $0x544] ss:$16 sps:$4 sm:$0xff]   ;;  %v3480_v46 = vld [vmem:[#allocation2 + $0x54c] ss:$16 sps:$4 sm:$0xff]  }
  0xb4   :  { %1410 = vmatprep.subr.bf16.mxu0 %v3384_v47  ;;  %1582 = vmatprep.subr.bf16.mxu1 %v3387_v48  ;;  %v3475_v47 = vld [vmem:[#allocation2 + $0x540] ss:$16 sps:$4 sm:$0xff]   ;;  %v3478_v48 = vld [vmem:[#allocation2 + $0x548] ss:$16 sps:$4 sm:$0xff]  }
  0xb7   :  { %1411 = vmatpush1.bf16.msra.mxu0 %v3382_v49  ;;  %1583 = vmatpush1.bf16.msra.mxu1 %v3385_v50  ;;  %v3483_v49 = vld [vmem:[#allocation2 + $0x564] ss:$16 sps:$4 sm:$0xff]   ;;  %v3486_v50 = vld [vmem:[#allocation2 + $0x56c] ss:$16 sps:$4 sm:$0xff]  }
  0xb8   :  { %1412 = vmatprep.subr.bf16.mxu0 %v3390_v51  ;;  %1584 = vmatprep.subr.bf16.mxu1 %v3393_v52  ;;  %v3481_v51 = vld [vmem:[#allocation2 + $0x560] ss:$16 sps:$4 sm:$0xff]   ;;  %v3484_v52 = vld [vmem:[#allocation2 + $0x568] ss:$16 sps:$4 sm:$0xff]  }
  0xbb   :  { %1413 = vmatpush1.bf16.msra.mxu0 %v3388_v53  ;;  %1585 = vmatpush1.bf16.msra.mxu1 %v3391_v54  ;;  %v3489_v53 = vld [vmem:[#allocation2 + $0x584] ss:$16 sps:$4 sm:$0xff]   ;;  %v3492_v54 = vld [vmem:[#allocation2 + $0x58c] ss:$16 sps:$4 sm:$0xff]  }
  0xbc   :  { %1414 = vmatprep.subr.bf16.mxu0 %v3396_v55  ;;  %1586 = vmatprep.subr.bf16.mxu1 %v3399_v56  ;;  %v3487_v55 = vld [vmem:[#allocation2 + $0x580] ss:$16 sps:$4 sm:$0xff]   ;;  %v3490_v56 = vld [vmem:[#allocation2 + $0x588] ss:$16 sps:$4 sm:$0xff]  }
  0xbf   :  { %1415 = vmatpush1.bf16.msra.mxu0 %v3394_v57  ;;  %1587 = vmatpush1.bf16.msra.mxu1 %v3397_v58  ;;  %v3495_v57 = vld [vmem:[#allocation2 + $0x5a4] ss:$16 sps:$4 sm:$0xff]   ;;  %v3498_v58 = vld [vmem:[#allocation2 + $0x5ac] ss:$16 sps:$4 sm:$0xff]  }
  0xc0   :  { %1416 = vmatprep.subr.bf16.mxu0 %v3402_v59  ;;  %1588 = vmatprep.subr.bf16.mxu1 %v3405_v60  ;;  %v3493_v59 = vld [vmem:[#allocation2 + $0x5a0] ss:$16 sps:$4 sm:$0xff]   ;;  %v3496_v60 = vld [vmem:[#allocation2 + $0x5a8] ss:$16 sps:$4 sm:$0xff]  }
  0xc3   :  { %1417 = vmatpush1.bf16.msra.mxu0 %v3400_v61  ;;  %1589 = vmatpush1.bf16.msra.mxu1 %v3403_v62  ;;  %v3501_v61 = vld [vmem:[#allocation2 + $0x5c4] ss:$16 sps:$4 sm:$0xff]   ;;  %v3504_v62 = vld [vmem:[#allocation2 + $0x5cc] ss:$16 sps:$4 sm:$0xff]  }
  0xc4   :  { %1418 = vmatprep.subr.bf16.mxu0 %v3408_v63  ;;  %1590 = vmatprep.subr.bf16.mxu1 %v3411_v0  ;;  %v3499_v63 = vld [vmem:[#allocation2 + $0x5c0] ss:$16 sps:$4 sm:$0xff]   ;;  %v3502_v0 = vld [vmem:[#allocation2 + $0x5c8] ss:$16 sps:$4 sm:$0xff]  }
  0xc7   :  { %1419 = vmatpush1.bf16.msra.mxu0 %v3406_v1  ;;  %1591 = vmatpush1.bf16.msra.mxu1 %v3409_v2  ;;  %v3507_v1 = vld [vmem:[#allocation2 + $0x5e4] ss:$16 sps:$4 sm:$0xff]   ;;  %v3510_v2 = vld [vmem:[#allocation2 + $0x5ec] ss:$16 sps:$4 sm:$0xff]  }
  0xc8   :  { %1431 = vmatprep.subr.bf16.mxu0 %v3417_v3  ;;  %1603 = vmatprep.subr.bf16.mxu1 %v3420_v4  ;;  %v3505_v3 = vld [vmem:[#allocation2 + $0x5e0] ss:$16 sps:$4 sm:$0xff]   ;;  %v3508_v4 = vld [vmem:[#allocation2 + $0x5e8] ss:$16 sps:$4 sm:$0xff]  }
  0xca   :  { %1421 = vmatmul.mubr.bf16.vlgmr.msra.gmra.mrb[0].mxu0 %v3412_v5  ;;  %1593 = vmatmul.mubr.bf16.vlgmr.msra.gmra.mrb[0].mxu1 %v3412_v5  ;;  %v3516_v5 = vld [vmem:[#allocation2 + $0x604] ss:$16 sps:$4 sm:$0xff]  }
  0xcb   :  { %1432 = vmatpush1.bf16.msra.mxu0 %v3415_v6  ;;  %1604 = vmatpush1.bf16.msra.mxu1 %v3418_v7  ;;  %v3519_v6 = vld [vmem:[#allocation2 + $0x60c] ss:$16 sps:$4 sm:$0xff]  }
  0xcc   :  { %1433 = vmatprep.subr.bf16.mxu0 %v3423_v8  ;;  %1605 = vmatprep.subr.bf16.mxu1 %v3426_v9  ;;  %v3511_v7 = vld [vmem:[%s4214_s0 + $0x10] ss:$28 sps:$4 sm:$0xff]   ;;  %v3517_v9 = vld [vmem:[#allocation2 + $0x608] ss:$16 sps:$4 sm:$0xff]  }
  0xcd   :  { %1463 = vmatprep.mubr.bf16.mxu0 %v3513_v12  ;;  %1635 = vmatprep.mubr.bf16.mxu1 %v3513_v12  ;;  %v3514_v8 = vld [vmem:[#allocation2 + $0x600] ss:$16 sps:$4 sm:$0xff]   ;;  %v3520_v12 = vld [vmem:[%s4214_s0 + $0x18] ss:$28 sps:$4 sm:$0xff]  }
  0xcf   :  { %1434 = vmatpush1.bf16.msra.mxu0 %v3421_v10  ;;  %1606 = vmatpush1.bf16.msra.mxu1 %v3424_v11  ;;  %v3523_v10 = vld [vmem:[%s4217_s3 + $0x4] ss:$8 sps:$4 sm:$0xff]   ;;  %v3767_v11 = vmov 0  }
  0xd0   :  { %1435 = vmatprep.subr.bf16.mxu0 %v3429_v13  ;;  %1607 = vmatprep.subr.bf16.mxu1 %v3432_v14  ;;  %v3521_v13 = vld [vmem:[%s4217_s3] ss:$8 sps:$4 sm:$0xff]   ;;  %v3526_v14 = vld [vmem:[%s4217_s3 + $0x14] ss:$8 sps:$4 sm:$0xff]  }
  0xd3   :  { %1436 = vmatpush1.bf16.msra.mxu0 %v3427_v15  ;;  %1608 = vmatpush1.bf16.msra.mxu1 %v3430_v16  ;;  %v3524_v15 = vld [vmem:[%s4217_s3 + $0x10] ss:$8 sps:$4 sm:$0xff]   ;;  %v3529_v16 = vld [vmem:[%s4217_s3 + $0x24] ss:$8 sps:$4 sm:$0xff]  }
  0xd4   :  { %1437 = vmatprep.subr.bf16.mxu0 %v3435_v17  ;;  %1609 = vmatprep.subr.bf16.mxu1 %v3438_v18  ;;  %v3527_v17 = vld [vmem:[%s4217_s3 + $0x20] ss:$8 sps:$4 sm:$0xff]   ;;  %v3532_v18 = vld [vmem:[%s4217_s3 + $0x34] ss:$8 sps:$4 sm:$0xff]  }
  0xd7   :  { %1438 = vmatpush1.bf16.msra.mxu0 %v3433_v19  ;;  %1610 = vmatpush1.bf16.msra.mxu1 %v3436_v20  ;;  %v3530_v19 = vld [vmem:[%s4217_s3 + $0x30] ss:$8 sps:$4 sm:$0xff]   ;;  %v3535_v20 = vld [vmem:[%s4217_s3 + $0x44] ss:$8 sps:$4 sm:$0xff]  }
  0xd8   :  { %1439 = vmatprep.subr.bf16.mxu0 %v3441_v21  ;;  %1611 = vmatprep.subr.bf16.mxu1 %v3444_v22  ;;  %v3533_v21 = vld [vmem:[%s4217_s3 + $0x40] ss:$8 sps:$4 sm:$0xff]   ;;  %v3538_v22 = vld [vmem:[%s4217_s3 + $0x54] ss:$8 sps:$4 sm:$0xff]  }
  0xdb   :  { %1440 = vmatpush1.bf16.msra.mxu0 %v3439_v23  ;;  %1612 = vmatpush1.bf16.msra.mxu1 %v3442_v24  ;;  %v3536_v23 = vld [vmem:[%s4217_s3 + $0x50] ss:$8 sps:$4 sm:$0xff]   ;;  %v3541_v24 = vld [vmem:[%s4217_s3 + $0x64] ss:$8 sps:$4 sm:$0xff]  }
  0xdc   :  { %1441 = vmatprep.subr.bf16.mxu0 %v3447_v25  ;;  %1613 = vmatprep.subr.bf16.mxu1 %v3450_v26  ;;  %v3539_v25 = vld [vmem:[%s4217_s3 + $0x60] ss:$8 sps:$4 sm:$0xff]   ;;  %v3544_v26 = vld [vmem:[%s4217_s3 + $0x74] ss:$8 sps:$4 sm:$0xff]  }
  0xdf   :  { %1442 = vmatpush1.bf16.msra.mxu0 %v3445_v27  ;;  %1614 = vmatpush1.bf16.msra.mxu1 %v3448_v28  ;;  %v3542_v27 = vld [vmem:[%s4217_s3 + $0x70] ss:$8 sps:$4 sm:$0xff]   ;;  %v3547_v28 = vld [vmem:[%s4217_s3 + $0x84] ss:$8 sps:$4 sm:$0xff]  }
  0xe0   :  { %1443 = vmatprep.subr.bf16.mxu0 %v3453_v29  ;;  %1615 = vmatprep.subr.bf16.mxu1 %v3456_v30  ;;  %v3545_v29 = vld [vmem:[%s4217_s3 + $0x80] ss:$8 sps:$4 sm:$0xff]   ;;  %v3550_v30 = vld [vmem:[%s4217_s3 + $0x94] ss:$8 sps:$4 sm:$0xff]  }
  0xe3   :  { %1444 = vmatpush1.bf16.msra.mxu0 %v3451_v31  ;;  %1616 = vmatpush1.bf16.msra.mxu1 %v3454_v32  ;;  %v3548_v31 = vld [vmem:[%s4217_s3 + $0x90] ss:$8 sps:$4 sm:$0xff]   ;;  %v3553_v32 = vld [vmem:[%s4217_s3 + $0xa4] ss:$8 sps:$4 sm:$0xff]  }
  0xe4   :  { %1445 = vmatprep.subr.bf16.mxu0 %v3459_v33  ;;  %1617 = vmatprep.subr.bf16.mxu1 %v3462_v34  ;;  %v3551_v33 = vld [vmem:[%s4217_s3 + $0xa0] ss:$8 sps:$4 sm:$0xff]   ;;  %v3556_v34 = vld [vmem:[%s4217_s3 + $0xb4] ss:$8 sps:$4 sm:$0xff]  }
  0xe7   :  { %1446 = vmatpush1.bf16.msra.mxu0 %v3457_v35  ;;  %1618 = vmatpush1.bf16.msra.mxu1 %v3460_v36  ;;  %v3554_v35 = vld [vmem:[%s4217_s3 + $0xb0] ss:$8 sps:$4 sm:$0xff]   ;;  %v3559_v36 = vld [vmem:[%s4217_s3 + $0xc4] ss:$8 sps:$4 sm:$0xff]  }
  0xe8   :  { %1447 = vmatprep.subr.bf16.mxu0 %v3465_v37  ;;  %1619 = vmatprep.subr.bf16.mxu1 %v3468_v38  ;;  %v3557_v37 = vld [vmem:[%s4217_s3 + $0xc0] ss:$8 sps:$4 sm:$0xff]   ;;  %v3562_v38 = vld [vmem:[%s4217_s3 + $0xd4] ss:$8 sps:$4 sm:$0xff]  }
  0xeb   :  { %1448 = vmatpush1.bf16.msra.mxu0 %v3463_v39  ;;  %1620 = vmatpush1.bf16.msra.mxu1 %v3466_v40  ;;  %v3560_v39 = vld [vmem:[%s4217_s3 + $0xd0] ss:$8 sps:$4 sm:$0xff]   ;;  %v3565_v40 = vld [vmem:[%s4217_s3 + $0xe4] ss:$8 sps:$4 sm:$0xff]  }
  0xec   :  { %1449 = vmatprep.subr.bf16.mxu0 %v3471_v41  ;;  %1621 = vmatprep.subr.bf16.mxu1 %v3474_v42  ;;  %v3563_v41 = vld [vmem:[%s4217_s3 + $0xe0] ss:$8 sps:$4 sm:$0xff]   ;;  %v3568_v42 = vld [vmem:[%s4217_s3 + $0xf4] ss:$8 sps:$4 sm:$0xff]  }
  0xef   :  { %1450 = vmatpush1.bf16.msra.mxu0 %v3469_v43  ;;  %1622 = vmatpush1.bf16.msra.mxu1 %v3472_v44  ;;  %v3566_v43 = vld [vmem:[%s4217_s3 + $0xf0] ss:$8 sps:$4 sm:$0xff]   ;;  %v3571_v44 = vld [vmem:[%s4217_s3 + $0x104] ss:$8 sps:$4 sm:$0xff]  }
  0xf0   :  { %1451 = vmatprep.subr.bf16.mxu0 %v3477_v45  ;;  %1623 = vmatprep.subr.bf16.mxu1 %v3480_v46  ;;  %v3617_v45 = vld [vmem:[#allocation4 + $0x40] sm:$0xff]  }
  0xf1   :  { %v3618_v46 = vld [vmem:[#allocation4] sm:$0xff]  }
  0xf3   :  { %1452 = vmatpush1.bf16.msra.mxu0 %v3475_v47  ;;  %1624 = vmatpush1.bf16.msra.mxu1 %v3478_v48  ;;  %v3619_v47 = vld [vmem:[#allocation4 + $0x48] sm:$0xff]  }
  0xf4   :  { %1453 = vmatprep.subr.bf16.mxu0 %v3483_v49  ;;  %1625 = vmatprep.subr.bf16.mxu1 %v3486_v50  ;;  %v3620_v48 = vld [vmem:[#allocation4 + $0x8] sm:$0xff]   ;;  %v3621_v49 = vld [vmem:[#allocation4 + $0x50] sm:$0xff]  }
  0xf5   :  { %v3622_v50 = vld [vmem:[#allocation4 + $0x10] sm:$0xff]  }
  0xf7   :  { %1454 = vmatpush1.bf16.msra.mxu0 %v3481_v51  ;;  %1626 = vmatpush1.bf16.msra.mxu1 %v3484_v52  ;;  %v3623_v51 = vld [vmem:[#allocation4 + $0x58] sm:$0xff]  }
  0xf8   :  { %1455 = vmatprep.subr.bf16.mxu0 %v3489_v53  ;;  %1627 = vmatprep.subr.bf16.mxu1 %v3492_v54  ;;  %v3624_v52 = vld [vmem:[#allocation4 + $0x18] sm:$0xff]   ;;  %v3625_v53 = vld [vmem:[#allocation4 + $0x60] sm:$0xff]  }
  0xf9   :  { %v3626_v54 = vld [vmem:[#allocation4 + $0x20] sm:$0xff]  }
  0xfb   :  { %1456 = vmatpush1.bf16.msra.mxu0 %v3487_v55  ;;  %1628 = vmatpush1.bf16.msra.mxu1 %v3490_v56  ;;  %v3627_v55 = vld [vmem:[#allocation4 + $0x68] sm:$0xff]   ;;  %v306_v56 = vlaneseq }
  0xfc   :  { %1457 = vmatprep.subr.bf16.mxu0 %v3495_v57  ;;  %1629 = vmatprep.subr.bf16.mxu1 %v3498_v58 }
  0xfd   :  { %v4025_v57 = vshrl.u32 %v306_v56, 7 }
  0xff   :  { %1458 = vmatpush1.bf16.msra.mxu0 %v3493_v59  ;;  %1630 = vmatpush1.bf16.msra.mxu1 %v3496_v60  ;;  %v308_v58 = vsub.s32 0, %v4025_v57  ;;  %v316_v59 = vsub.s32 2, %v4025_v57  ;;  %v304_v60 = vld [vmem:[%s4216_s2] sm:$0xf] }
 0x100   :  { %1459 = vmatprep.subr.bf16.mxu0 %v3501_v61  ;;  %1631 = vmatprep.subr.bf16.mxu1 %v3504_v62  ;;  %v312_v61 = vsub.s32 1, %v4025_v57  ;;  %v320_v62 = vsub.s32 3, %v4025_v57  ;;  %v3634_v57 = vld [vmem:[%s4221_s7 + $0x8] sm:$0xff]  }
 0x103   :  { %1460 = vmatpush1.bf16.msra.mxu0 %v3499_v63  ;;  %1632 = vmatpush1.bf16.msra.mxu1 %v3502_v0  ;;  %v309_v63 = vrot.slane %v304_v60, %v308_v58  ;;  %v317_v0 = vrot.slane %v304_v60, %v316_v59  ;;  %v3610_v59 = vld [vmem:[%s4217_s3 + $0x1d4] ss:$8 sps:$4 sm:$0xff]  }
 0x104   :  { %1461 = vmatprep.subr.bf16.mxu0 %v3507_v1  ;;  %1633 = vmatprep.subr.bf16.mxu1 %v3510_v2  ;;  %v313_v1 = vrot.slane %v304_v60, %v312_v61  ;;  %v321_v2 = vrot.slane %v304_v60, %v320_v62  ;;  %v3608_v60 = vld [vmem:[%s4217_s3 + $0x1d0] ss:$8 sps:$4 sm:$0xff]   ;;  %v3613_v62 = vld [vmem:[%s4217_s3 + $0x1e4] ss:$8 sps:$4 sm:$0xff]  }
 0x107   :  { %1462 = vmatpush1.bf16.msra.mxu0 %v3505_v3  ;;  %1634 = vmatpush1.bf16.msra.mxu1 %v3508_v4 }
 0x108   :  { %1474 = vmatprep.subr.bf16.mxu0 %v3516_v5  ;;  %1646 = vmatprep.subr.bf16.mxu1 %v3519_v6 }
 0x10a   :  { %1464 = vmatmul.mubr.bf16.vlgmr.msra.gmra.mrb[0].mxu0 %v3511_v7  ;;  %1636 = vmatmul.mubr.bf16.vlgmr.msra.gmra.mrb[0].mxu1 %v3511_v7 }
 0x10b   :  { %1475 = vmatpush1.bf16.msra.mxu0 %v3514_v8  ;;  %1647 = vmatpush1.bf16.msra.mxu1 %v3517_v9 }
 0x10c   :  { %1506 = vmatprep.mubr.bf16.mxu0 %v3767_v11  ;;  %1678 = vmatprep.mubr.bf16.mxu1 %v3767_v11 }
 0x10d   :  { %2097 = vmatprep.subr.bf16.mxu0 %v3523_v10  ;;  %3057 = vmatprep.subr.bf16.mxu1 %v3617_v45  ;;  %v3590_v45 = vld [vmem:[%s4217_s3 + $0x170] ss:$8 sps:$4 sm:$0xff]  }
 0x116   :  { %2947 = vmatmul.mubr.msk.bf16.vlgmr.msra.gmra.mrb[0].mxu0 %vm1341_vm0, %v3520_v12  ;;  %2948 = vmatmul.mubr.msk.bf16.vlgmr.msra.gmra.mrb[0].mxu1 %vm1341_vm0, %v3520_v12 }
 0x117   :  { %2098 = vmatpush1.bf16.msra.mxu0 %v3521_v13  ;;  %3058 = vmatpush3.bf16.msra.mxu1 %v3618_v46  ;;  %v3595_v46 = vld [vmem:[%s4217_s3 + $0x184] ss:$8 sps:$4 sm:$0xff]  }
 0x118   :  { %2099 = vmatprep.subr.bf16.mxu0 %v3526_v14  ;;  %3059 = vmatprep.subr.bf16.mxu1 %v3619_v47  ;;  %v3593_v47 = vld [vmem:[%s4217_s3 + $0x180] ss:$8 sps:$4 sm:$0xff]  }
 0x11b   :  { %2100 = vmatpush1.bf16.msra.mxu0 %v3524_v15  ;;  %3060 = vmatpush3.bf16.msra.mxu1 %v3620_v48  ;;  %v3598_v48 = vld [vmem:[%s4217_s3 + $0x194] ss:$8 sps:$4 sm:$0xff]  }
 0x11c   :  { %2101 = vmatprep.subr.bf16.mxu0 %v3529_v16  ;;  %3061 = vmatprep.subr.bf16.mxu1 %v3621_v49  ;;  %v3596_v49 = vld [vmem:[%s4217_s3 + $0x190] ss:$8 sps:$4 sm:$0xff]  }
 0x11f   :  { %2102 = vmatpush1.bf16.msra.mxu0 %v3527_v17  ;;  %3062 = vmatpush3.bf16.msra.mxu1 %v3622_v50  ;;  %v3601_v50 = vld [vmem:[%s4217_s3 + $0x1a4] ss:$8 sps:$4 sm:$0xff]  }
 0x120   :  { %2103 = vmatprep.subr.bf16.mxu0 %v3532_v18  ;;  %3063 = vmatprep.subr.bf16.mxu1 %v3623_v51  ;;  %v3599_v51 = vld [vmem:[%s4217_s3 + $0x1a0] ss:$8 sps:$4 sm:$0xff]  }
 0x123   :  { %2104 = vmatpush1.bf16.msra.mxu0 %v3530_v19  ;;  %3064 = vmatpush3.bf16.msra.mxu1 %v3624_v52  ;;  %v3604_v52 = vld [vmem:[%s4217_s3 + $0x1b4] ss:$8 sps:$4 sm:$0xff]  }
 0x124   :  { %2105 = vmatprep.subr.bf16.mxu0 %v3535_v20  ;;  %3065 = vmatprep.subr.bf16.mxu1 %v3625_v53  ;;  %v3602_v53 = vld [vmem:[%s4217_s3 + $0x1b0] ss:$8 sps:$4 sm:$0xff]  }
 0x127   :  { %2106 = vmatpush1.bf16.msra.mxu0 %v3533_v21  ;;  %3066 = vmatpush3.bf16.msra.mxu1 %v3626_v54  ;;  %v3607_v54 = vld [vmem:[%s4217_s3 + $0x1c4] ss:$8 sps:$4 sm:$0xff]  }
 0x128   :  { %2107 = vmatprep.subr.bf16.mxu0 %v3538_v22  ;;  %3067 = vmatprep.subr.bf16.mxu1 %v3627_v55  ;;  %v3605_v55 = vld [vmem:[%s4217_s3 + $0x1c0] ss:$8 sps:$4 sm:$0xff]  }
 0x12b   :  { %2108 = vmatpush1.bf16.msra.mxu0 %v3536_v23 }
 0x12c   :  { %2109 = vmatprep.subr.bf16.mxu0 %v3541_v24 }
 0x12f   :  { %2110 = vmatpush1.bf16.msra.mxu0 %v3539_v25 }
 0x130   :  { %2111 = vmatprep.subr.bf16.mxu0 %v3544_v26 }
 0x133   :  { %2112 = vmatpush1.bf16.msra.mxu0 %v3542_v27 }
 0x134   :  { %2113 = vmatprep.subr.bf16.mxu0 %v3547_v28 }
 0x137   :  { %2114 = vmatpush1.bf16.msra.mxu0 %v3545_v29 }
 0x138   :  { %2115 = vmatprep.subr.bf16.mxu0 %v3550_v30 }
 0x13b   :  { %2116 = vmatpush1.bf16.msra.mxu0 %v3548_v31  ;;  %v3569_v31 = vld [vmem:[%s4217_s3 + $0x100] ss:$8 sps:$4 sm:$0xff]  }
 0x13c   :  { %2117 = vmatprep.subr.bf16.mxu0 %v3553_v32  ;;  %v3574_v32 = vld [vmem:[%s4217_s3 + $0x114] ss:$8 sps:$4 sm:$0xff]  }
 0x13f   :  { %2118 = vmatpush1.bf16.msra.mxu0 %v3551_v33  ;;  %v3572_v33 = vld [vmem:[%s4217_s3 + $0x110] ss:$8 sps:$4 sm:$0xff]  }
 0x140   :  { %2119 = vmatprep.subr.bf16.mxu0 %v3556_v34  ;;  %v3577_v34 = vld [vmem:[%s4217_s3 + $0x124] ss:$8 sps:$4 sm:$0xff]  }
 0x143   :  { %2120 = vmatpush1.bf16.msra.mxu0 %v3554_v35  ;;  %v3575_v35 = vld [vmem:[%s4217_s3 + $0x120] ss:$8 sps:$4 sm:$0xff]  }
 0x144   :  { %2121 = vmatprep.subr.bf16.mxu0 %v3559_v36  ;;  %v3580_v36 = vld [vmem:[%s4217_s3 + $0x134] ss:$8 sps:$4 sm:$0xff]  }
 0x147   :  { %2122 = vmatpush1.bf16.msra.mxu0 %v3557_v37  ;;  %v3578_v37 = vld [vmem:[%s4217_s3 + $0x130] ss:$8 sps:$4 sm:$0xff]  }
 0x148   :  { %2123 = vmatprep.subr.bf16.mxu0 %v3562_v38  ;;  %v3583_v38 = vld [vmem:[%s4217_s3 + $0x144] ss:$8 sps:$4 sm:$0xff]  }
 0x14b   :  { %2124 = vmatpush1.bf16.msra.mxu0 %v3560_v39  ;;  %v3581_v39 = vld [vmem:[%s4217_s3 + $0x140] ss:$8 sps:$4 sm:$0xff]  }
 0x14c   :  { %2125 = vmatprep.subr.bf16.mxu0 %v3565_v40  ;;  %v3586_v40 = vld [vmem:[%s4217_s3 + $0x154] ss:$8 sps:$4 sm:$0xff]  }
 0x14f   :  { %2126 = vmatpush1.bf16.msra.mxu0 %v3563_v41  ;;  %v3584_v41 = vld [vmem:[%s4217_s3 + $0x150] ss:$8 sps:$4 sm:$0xff]  }
 0x150   :  { %2127 = vmatprep.subr.bf16.mxu0 %v3568_v42  ;;  %v3589_v42 = vld [vmem:[%s4217_s3 + $0x164] ss:$8 sps:$4 sm:$0xff]  }
 0x153   :  { %2128 = vmatpush1.bf16.msra.mxu0 %v3566_v43  ;;  %v3587_v43 = vld [vmem:[%s4217_s3 + $0x160] ss:$8 sps:$4 sm:$0xff]  }
 0x154   :  { %2140 = vmatprep.subr.bf16.mxu0 %v3571_v44  ;;  %v3592_v44 = vld [vmem:[%s4217_s3 + $0x174] ss:$8 sps:$4 sm:$0xff]  }
 0x1e9   :  { %v1508_v3 = vpop.f32.mrb[0].mxu0  ;;  %v1680_v4 = vpop.f32.mrb[0].mxu1 }
 0x1ea   :  { %v3166_v5 = vadd.f32 %v1508_v3, %v309_v63  ;;  %v3170_v6 = vadd.f32 %v1680_v4, %v317_v0  ;;  %v1510_v7 = vpop.f32.mrb[1].mxu0  ;;  %v1682_v8 = vpop.f32.mrb[1].mxu1  ;;  %v3629_v3 = vld [vmem:[#allocation4 + $0x70] sm:$0xff]  }
 0x1eb   :  { %v3167_v9 = vadd.f32 %v1510_v7, %v313_v1  ;;  %v3171_v10 = vadd.f32 %v1682_v8, %v321_v2  ;;  %v1512_v11 = vpop.f32.mrb[2].mxu0  ;;  %v1684_v12 = vpop.f32.mrb[2].mxu1  ;;  %v3630_v4 = vld [vmem:[#allocation4 + $0x30] sm:$0xff]   ;;  %v3768_v7 = vmov 0.0   ;;  %v1765_v8 = vld [vmem:[%s4218_s4] sm:$0x3] }
 0x1ec   :  { %v3168_v13 = vadd.f32 %v1512_v11, %v309_v63  ;;  %v3172_v14 = vadd.f32 %v1684_v12, %v317_v0  ;;  %v1514_v15 = vpop.f32.mrb[3].mxu0  ;;  %v1686_v16 = vpop.f32.mrb[3].mxu1  ;;  %v1689_v19 = vmax.f32 %v3166_v5, 0.0  ;;  %v1691_v20 = vmax.f32 %v3170_v6, 0.0  ;;  %v3611_v63 = vld [vmem:[%s4217_s3 + $0x1e0] ss:$8 sps:$4 sm:$0xff]  }
 0x1ed   :  { %v3169_v17 = vadd.f32 %v1514_v15, %v313_v1  ;;  %v3173_v18 = vadd.f32 %v1686_v16, %v321_v2  ;;  %v1690_v23 = vmax.f32 %v3167_v9, 0.0  ;;  %v1692_v24 = vmax.f32 %v3171_v10, 0.0  ;;  %v3616_v0 = vld [vmem:[%s4217_s3 + $0x1f4] ss:$8 sps:$4 sm:$0xff]   ;;  %v3614_v1 = vld [vmem:[%s4217_s3 + $0x1f0] ss:$8 sps:$4 sm:$0xff]  }
 0x1ee   :  { %v1693_v21 = vmax.f32 %v3168_v13, 0.0  ;;  %v1695_v22 = vmax.f32 %v3172_v14, 0.0  ;;  %v3628_v2 = vld [vmem:[#allocation4 + $0x28] sm:$0xff]   ;;  %v3631_v5 = vld [vmem:[#allocation4 + $0x78] sm:$0xff]   ;;  %v1770_v9 = vrot.slane %v1765_v8, %v308_v58  ;;  %v1774_v10 = vrot.slane %v1765_v8, %v312_v61  ;;  %v3633_v58 = vld [vmem:[%s4221_s7] sm:$0xff]  }
 0x1ef   :  { %v1694_v25 = vmax.f32 %v3169_v17, 0.0  ;;  %v1696_v26 = vmax.f32 %v3173_v18, 0.0  ;;  %3068 = vmatpush3.bf16.msra.mxu1 %v3628_v2  ;;  %v3632_v6 = vld [vmem:[#allocation4 + $0x38] sm:$0xff]   ;;  %v3635_v61 = vld [vmem:[%s4221_s7 + $0x10] sm:$0xff]  }
 0x1f0   :  { %v1697_v27 = vpack.c.bf16 %v1693_v21, %v1689_v19  ;;  %v4038_v28 = vpack.c.bf16 %v1695_v22, %v1691_v20  ;;  %3069 = vmatprep.subr.bf16.mxu1 %v3629_v3  ;;  %v3651_v2 = vld [vmem:[#allocation7 + $0x10] sm:$0xff]   ;;  %v3652_v3 = vld [vmem:[#allocation7 + $0x18] sm:$0xff]  }
 0x1f1   :  { %v1698_v29 = vpack.c.bf16 %v1694_v25, %v1690_v23  ;;  %v1700_v30 = vpack.c.bf16 %v1696_v26, %v1692_v24  ;;  %v3636_v25 = vld [vmem:[%s4221_s7 + $0x18] sm:$0xff]   ;;  %v3637_v26 = vld [vmem:[%s4221_s7 + $0x20] sm:$0xff]  }
 0x1f2   :  { %v3656_v8 = vld [vmem:[#allocation7 + $0x38] sm:$0xff]  }
 0x1f3   :  { %2129 = vmatprep.mubr.bf16.mxu0 %v1698_v29  ;;  %3070 = vmatpush3.bf16.msra.mxu1 %v3630_v4  ;;  %v3640_v29 = vld [vmem:[%s4221_s7 + $0x38] sm:$0xff]   ;;  %v3653_v4 = vld [vmem:[#allocation7 + $0x20] sm:$0xff]  }
 0x1f4   :  { %2130 = vmatmul.mubr.bf16.vlgmr.msra.gmra.mrb[4].mxu0 %v1697_v27  ;;  %3071 = vmatprep.subr.bf16.mxu1 %v3631_v5  ;;  %v3638_v27 = vld [vmem:[%s4221_s7 + $0x28] sm:$0xff]  }
 0x1f5   :  { %2141 = vmatpush1.bf16.msra.mxu0 %v3569_v31  ;;  %2172 = vmatprep.mubr.bf16.mxu0 %v1700_v30  ;;  %v3013_v31 = vld [vmem:[%s4220_s6] ss:$0 sm:$0xff]  ;;  %v3654_v5 = vld [vmem:[#allocation7 + $0x28] sm:$0xff]  }
 0x1f6   :  { %2142 = vmatprep.subr.bf16.mxu0 %v3574_v32 }
 0x1f7   :  { %3072 = vmatpush3.bf16.msra.mxu1 %v3632_v6  ;;  %v3655_v6 = vld [vmem:[#allocation7 + $0x30] sm:$0xff]  }
 0x1f8   :  { %3106 = vmatprep.subr.bf16.mxu1 %v3768_v7 }
 0x1f9   :  { %2143 = vmatpush1.bf16.msra.mxu0 %v3572_v33 }
 0x1fa   :  { %2144 = vmatprep.subr.bf16.mxu0 %v3577_v34 }
 0x1fd   :  { %2145 = vmatpush1.bf16.msra.mxu0 %v3575_v35 }
 0x1fe   :  { %2146 = vmatprep.subr.bf16.mxu0 %v3580_v36 }
 0x201   :  { %2147 = vmatpush1.bf16.msra.mxu0 %v3578_v37 }
 0x202   :  { %2148 = vmatprep.subr.bf16.mxu0 %v3583_v38 }
 0x205   :  { %2149 = vmatpush1.bf16.msra.mxu0 %v3581_v39 }
 0x206   :  { %2150 = vmatprep.subr.bf16.mxu0 %v3586_v40 }
 0x209   :  { %2151 = vmatpush1.bf16.msra.mxu0 %v3584_v41  ;;  %v3641_v41 = vld [vmem:[#allocation6] sm:$0xff]  }
 0x20a   :  { %2152 = vmatprep.subr.bf16.mxu0 %v3589_v42 }
 0x20d   :  { %2153 = vmatpush1.bf16.msra.mxu0 %v3587_v43  ;;  %v3642_v43 = vld [vmem:[#allocation6 + $0x8] sm:$0xff]  }
 0x20e   :  { %2154 = vmatprep.subr.bf16.mxu0 %v3592_v44  ;;  %v3643_v44 = vld [vmem:[#allocation6 + $0x10] sm:$0xff]  }
 0x211   :  { %2155 = vmatpush1.bf16.msra.mxu0 %v3590_v45  ;;  %v3644_v45 = vld [vmem:[#allocation6 + $0x18] sm:$0xff]  }
 0x212   :  { %2156 = vmatprep.subr.bf16.mxu0 %v3595_v46  ;;  %v3645_v46 = vld [vmem:[#allocation6 + $0x20] sm:$0xff]  }
 0x215   :  { %2157 = vmatpush1.bf16.msra.mxu0 %v3593_v47  ;;  %v3646_v47 = vld [vmem:[#allocation6 + $0x28] sm:$0xff]  }
 0x216   :  { %2158 = vmatprep.subr.bf16.mxu0 %v3598_v48  ;;  %v3647_v48 = vld [vmem:[#allocation6 + $0x30] sm:$0xff]  }
 0x219   :  { %2159 = vmatpush1.bf16.msra.mxu0 %v3596_v49  ;;  %v3648_v49 = vld [vmem:[#allocation6 + $0x38] sm:$0xff]  }
 0x21a   :  { %2160 = vmatprep.subr.bf16.mxu0 %v3601_v50  ;;  %v3030_v50 = vld [vmem:[%s4222_s8] ss:$0 sm:$0xff] }
 0x21d   :  { %2161 = vmatpush1.bf16.msra.mxu0 %v3599_v51 }
 0x21e   :  { %2162 = vmatprep.subr.bf16.mxu0 %v3604_v52 }
 0x221   :  { %2163 = vmatpush1.bf16.msra.mxu0 %v3602_v53 }
 0x222   :  { %2164 = vmatprep.subr.bf16.mxu0 %v3607_v54 }
 0x225   :  { %2165 = vmatpush1.bf16.msra.mxu0 %v3605_v55 }
 0x226   :  { %2166 = vmatprep.subr.bf16.mxu0 %v3610_v59 }
 0x229   :  { %2167 = vmatpush1.bf16.msra.mxu0 %v3608_v60 }
 0x22a   :  { %2168 = vmatprep.subr.bf16.mxu0 %v3613_v62 }
 0x22d   :  { %2169 = vmatpush1.bf16.msra.mxu0 %v3611_v63  ;;  %v3649_v63 = vld [vmem:[#allocation7] sm:$0xff]  }
 0x22e   :  { %2170 = vmatprep.subr.bf16.mxu0 %v3616_v0 }
 0x231   :  { %2171 = vmatpush1.bf16.msra.mxu0 %v3614_v1  ;;  %v3650_v1 = vld [vmem:[#allocation7 + $0x8] sm:$0xff]  }
 0x234   :  { %2173 = vmatmul.mubr.bf16.vlgmr.msra.gmra.mrb[4].mxu0 %v4038_v28  ;;  %v3639_v28 = vld [vmem:[%s4221_s7 + $0x30] sm:$0xff]  }
 0x307   :  { %v2174_v11 = vpop.f32.mrb[4].mxu0 }
 0x308   :  { %v3174_v12 = vadd.f32 %v2174_v11, %v1770_v9  ;;  %v2176_v13 = vpop.f32.mrb[5].mxu0 }
 0x309   :  { %v3175_v14 = vadd.f32 %v2176_v13, %v1774_v10  ;;  %v2178_v15 = vpop.f32.mrb[6].mxu0 }
 0x30a   :  { %v3176_v16 = vadd.f32 %v2178_v15, %v1770_v9  ;;  %v2180_v17 = vpop.f32.mrb[7].mxu0  ;;  %v2183_v19 = vmax.f32 %v3174_v12, 0.0  ;;  %v3039_v9 = vld [vmem:[%s4224_s10] ss:$0 sm:$0xff] }
 0x30b   :  { %v3177_v18 = vadd.f32 %v2180_v17, %v1774_v10  ;;  %v2184_v21 = vmax.f32 %v3175_v14, 0.0 }
 0x30c   :  { %v2185_v20 = vmax.f32 %v3176_v16, 0.0 }
 0x30d   :  { %v2186_v22 = vmax.f32 %v3177_v18, 0.0 }
 0x30e   :  { %v2187_v23 = vpack.c.bf16 %v2185_v20, %v2183_v19  ;;  %v2711_v19 = vand.u32 127, %v306_v56 }
 0x30f   :  { %v2188_v24 = vpack.c.bf16 %v2186_v22, %v2184_v21 }
 0x310   :  { %vm2712_vm2 = vcmp.lt.s32.totalorder %v2711_v19, 10 }
 0x311   :  { %2356 = vmatprep.mubr.bf16.mxu1 %v2188_v24 }
 0x312   :  { %2357 = vmatmul.mubr.bf16.vlgmr.msra.gmra.mrb[4].mxu1 %v2187_v23 }
 0x313   :  { %3107 = vmatpush3.bf16.msra.mxu1 %v3633_v58  ;;  %3122 = vmatprep.mubr.msk.bf16.mxu1 %vm3769_vm1, %v3768_v7 }
 0x314   :  { %3108 = vmatprep.subr.bf16.mxu1 %v3768_v7 }
 0x317   :  { %3109 = vmatpush3.bf16.msra.mxu1 %v3634_v57 }
 0x318   :  { %3110 = vmatprep.subr.bf16.mxu1 %v3768_v7 }
 0x31b   :  { %3111 = vmatpush3.bf16.msra.mxu1 %v3635_v61 }
 0x31c   :  { %3112 = vmatprep.subr.bf16.mxu1 %v3768_v7 }
 0x31f   :  { %3113 = vmatpush3.bf16.msra.mxu1 %v3636_v25 }
 0x320   :  { %3114 = vmatprep.subr.bf16.mxu1 %v3768_v7 }
 0x323   :  { %3115 = vmatpush3.bf16.msra.mxu1 %v3637_v26 }
 0x324   :  { %3116 = vmatprep.subr.bf16.mxu1 %v3768_v7 }
 0x327   :  { %3117 = vmatpush3.bf16.msra.mxu1 %v3638_v27 }
 0x328   :  { %3118 = vmatprep.subr.bf16.mxu1 %v3768_v7 }
 0x32b   :  { %3119 = vmatpush3.bf16.msra.mxu1 %v3639_v28 }
 0x32c   :  { %3120 = vmatprep.subr.bf16.mxu1 %v3768_v7 }
 0x32f   :  { %3121 = vmatpush3.bf16.msra.mxu1 %v3640_v29 }
 0x330   :  { %3126 = vmatprep.subr.bf16.mxu1 %v3768_v7 }
 0x3e5   :  { %v3073_v30 = vpop.f32.mrb[4].mxu1 }
 0x3e6   :  { %v3074_v32 = vpop.f32.mrb[5].mxu1 }
 0x3e7   :  { %v3075_v33 = vadd.f32 %v3074_v32, %v3073_v30  ;;  %v3076_v34 = vpop.f32.mrb[6].mxu1 }
 0x3e8   :  { %v3077_v35 = vpop.f32.mrb[7].mxu1 }
 0x3e9   :  { %v2359_v36 = vadd.f32 %v3075_v33, %v3013_v31  ;;  %v3078_v37 = vadd.f32 %v3077_v35, %v3076_v34 }
 0x3eb   :  { %v2362_v38 = vadd.f32 %v3078_v37, %v3013_v31  ;;  %v2365_v39 = vmax.f32 %v2359_v36, 0.0 }
 0x3ed   :  { %v2366_v40 = vmax.f32 %v2362_v38, 0.0 }
 0x3ef   :  { %v2367_v42 = vpack.c.bf16 %v2366_v40, %v2365_v39 }
 0x3f1   :  { %3123 = vmatmul.mubr.bf16.vlgmr.msra.gmra.mrb[8].mxu1 %v2367_v42 }
 0x3f2   :  { %3127 = vmatpush3.bf16.msra.mxu1 %v3641_v41  ;;  %3142 = vmatprep.mubr.msk.bf16.mxu1 %vm3769_vm1, %v3768_v7 }
 0x3f3   :  { %3128 = vmatprep.subr.bf16.mxu1 %v3768_v7 }
 0x3f6   :  { %3129 = vmatpush3.bf16.msra.mxu1 %v3642_v43 }
 0x3f7   :  { %3130 = vmatprep.subr.bf16.mxu1 %v3768_v7 }
 0x3fa   :  { %3131 = vmatpush3.bf16.msra.mxu1 %v3643_v44 }
 0x3fb   :  { %3132 = vmatprep.subr.bf16.mxu1 %v3768_v7 }
 0x3fe   :  { %3133 = vmatpush3.bf16.msra.mxu1 %v3644_v45 }
 0x3ff   :  { %3134 = vmatprep.subr.bf16.mxu1 %v3768_v7 }
 0x402   :  { %3135 = vmatpush3.bf16.msra.mxu1 %v3645_v46 }
 0x403   :  { %3136 = vmatprep.subr.bf16.mxu1 %v3768_v7 }
 0x406   :  { %3137 = vmatpush3.bf16.msra.mxu1 %v3646_v47 }
 0x407   :  { %3138 = vmatprep.subr.bf16.mxu1 %v3768_v7 }
 0x40a   :  { %3139 = vmatpush3.bf16.msra.mxu1 %v3647_v48 }
 0x40b   :  { %3140 = vmatprep.subr.bf16.mxu1 %v3768_v7 }
 0x40e   :  { %3141 = vmatpush3.bf16.msra.mxu1 %v3648_v49 }
 0x40f   :  { %3146 = vmatprep.subr.bf16.mxu1 %v3768_v7 }
 0x4c4   :  { %v2473_v51 = vpop.f32.mrb[8].mxu1 }
 0x4c5   :  { %v2474_v52 = vadd.f32 %v3030_v50, %v2473_v51  ;;  %v3124_v53 = vpop.f32.mrb[9].mxu1 }
 0x4c6   :  { %v2476_v54 = vpop.f32.mrb[10].mxu1 }
 0x4c7   :  { %v2477_v55 = vadd.f32 %v3030_v50, %v2476_v54  ;;  %v3125_v59 = vpop.f32.mrb[11].mxu1  ;;  %v2480_v60 = vmax.f32 %v2474_v52, 0.0 }
 0x4c9   :  { %v2481_v62 = vmax.f32 %v2477_v55, 0.0 }
 0x4cb   :  { %v2482_v0 = vpack.c.bf16 %v2481_v62, %v2480_v60 }
 0x4cd   :  { %3143 = vmatmul.mubr.bf16.vlgmr.msra.gmra.mrb[12].mxu1 %v2482_v0 }
 0x4ce   :  { %3147 = vmatpush3.bf16.msra.mxu1 %v3649_v63  ;;  %3162 = vmatprep.mubr.msk.bf16.mxu1 %vm3769_vm1, %v3768_v7 }
 0x4cf   :  { %3148 = vmatprep.subr.bf16.mxu1 %v3768_v7 }
 0x4d2   :  { %3149 = vmatpush3.bf16.msra.mxu1 %v3650_v1 }
 0x4d3   :  { %3150 = vmatprep.subr.bf16.mxu1 %v3768_v7 }
 0x4d6   :  { %3151 = vmatpush3.bf16.msra.mxu1 %v3651_v2 }
 0x4d7   :  { %3152 = vmatprep.subr.bf16.mxu1 %v3768_v7 }
 0x4da   :  { %3153 = vmatpush3.bf16.msra.mxu1 %v3652_v3 }
 0x4db   :  { %3154 = vmatprep.subr.bf16.mxu1 %v3768_v7 }
 0x4de   :  { %3155 = vmatpush3.bf16.msra.mxu1 %v3653_v4 }
 0x4df   :  { %3156 = vmatprep.subr.bf16.mxu1 %v3768_v7 }
 0x4e2   :  { %3157 = vmatpush3.bf16.msra.mxu1 %v3654_v5 }
 0x4e3   :  { %3158 = vmatprep.subr.bf16.mxu1 %v3768_v7 }
 0x4e6   :  { %3159 = vmatpush3.bf16.msra.mxu1 %v3655_v6 }
 0x4e7   :  { %3160 = vmatprep.subr.bf16.mxu1 %v3768_v7  ;;  %v3048_v7 = vld [vmem:[%s4226_s12] ss:$0 sm:$0xff] }
 0x4ea   :  { %3161 = vmatpush3.bf16.msra.mxu1 %v3656_v8 }
 0x5a0   :  { %v2588_v10 = vpop.f32.mrb[12].mxu1 }
 0x5a1   :  { %v2589_v11 = vadd.f32 %v3039_v9, %v2588_v10  ;;  %v3144_v12 = vpop.f32.mrb[13].mxu1 }
 0x5a2   :  { %v2591_v13 = vpop.f32.mrb[14].mxu1 }
 0x5a3   :  { %v2592_v14 = vadd.f32 %v3039_v9, %v2591_v13  ;;  %v3145_v15 = vpop.f32.mrb[15].mxu1  ;;  %v2595_v16 = vmax.f32 %v2589_v11, 0.0 }
 0x5a5   :  { %v2596_v17 = vmax.f32 %v2592_v14, 0.0 }
 0x5a7   :  { %v2597_v18 = vpack.c.bf16 %v2596_v17, %v2595_v16 }
 0x5a9   :  { %3163 = vmatmul.mubr.bf16.vlgmr.msra.gmra.mrb[16].mxu1 %v2597_v18 }
 0x67c   :  { %v2703_v20 = vpop.f32.mrb[16].mxu1 }
 0x67d   :  { %v2704_v21 = vadd.f32 %v3048_v7, %v2703_v20  ;;  %v3164_v22 = vpop.f32.mrb[17].mxu1 }
 0x67e   :  { %v2706_v23 = vpop.f32.mrb[18].mxu1 }
 0x67f   :  { %v2707_v24 = vadd.f32 %v3048_v7, %v2706_v23  ;;  %v3165_v58 = vpop.f32.mrb[19].mxu1  ;;  %v2713_v57 = vsel %vm2712_vm2, %v2704_v21, -1e+30 }
 0x680   :  { %2715 = vmax.xlane.f32.xlu0 %v2713_v57 }
 0x681   :  { %v2714_v61 = vsel %vm2712_vm2, %v2707_v24, -1e+30 }
 0x684   :  { %2717 = vmax.xlane.f32.xlu0 %v2714_v61 }
 0x70d   :  { %v2716_v25 = vpop.xlane.xlu0 %2715 }
 0x70e   :  { %v2719_v26 = vsub.f32 %v2713_v57, %v2716_v25 }
 0x710   :  { %v2721_v27 = vmul.f32 1.442695, %v2719_v26 }
 0x711   :  { %v2718_v28 = vpop.xlane.xlu0 %2717 }
 0x712   :  { %v2720_v56 = vsub.f32 %v2714_v61, %v2718_v28  ;;  %3657 = vpow2.f32 %v2721_v27 }
 0x714   :  { %v2723_v29 = vmul.f32 1.442695, %v2720_v56 }
 0x716   :  { %3659 = vpow2.f32 %v2723_v29 }
 0x71c   :  { %v3658_v30 = vpop.eup %3657 }
 0x71d   :  { %2725 = vadd.xlane.f32.xlu1 %v3658_v30 }
 0x720   :  { %v3660_v31 = vpop.eup %3659 }
 0x721   :  { %2727 = vadd.xlane.f32.xlu1 %v3660_v31 }
 0x7aa   :  { %v2726_v32 = vpop.xlane.xlu1 %2725 }
 0x7ab   :  { %3661 = vlog2.f32 %v2726_v32 }
 0x7ae   :  { %v2728_v33 = vpop.xlane.xlu1 %2727 }
 0x7af   :  { %3663 = vlog2.f32 %v2728_v33 }
 0x7b5   :  { %v3662_v34 = vpop.eup %3661 }
 0x7b6   :  { %v2730_v35 = vmul.f32 0.6931472, %v3662_v34 }
 0x7b8   :  { %v2733_v36 = vsub.f32 %v2719_v26, %v2730_v35 }
 0x7b9   :  { %v3664_v37 = vpop.eup %3663 }
 0x7ba   :  { %2735 = vst [vmem:[%s4227_s13] sm:$0xff] %v2733_v36  ;;  %v2732_v38 = vmul.f32 0.6931472, %v3664_v37 }
 0x7bc   :  { %v2734_v39 = vsub.f32 %v2720_v56, %v2732_v38 }
 0x7be   :  { %2736 = vst [vmem:[%s4227_s13 + $0x8] sm:$0xff] %v2734_v39 }
 0x7bf   :  { %2741 = vsyncpa [#allocation3], 1 }
 0x7c0   :  { %2742 = vsyncpa [#allocation5], 1 }
 0x7c1   :  { %2743 = vsyncpa [#allocation8], 1 }

</bundles_post_ra>
